<compile_context>
chip_gen: v7x
topology: tpu7x:2x2x1
jax: 0.10.0
libtpu: 0.0.40
codegen_flags: <defaults>
</compile_context>

<pallas_src>
import jax
import jax.numpy as jnp
from jax import lax
from jax.experimental import pallas as pl
from jax.experimental.pallas import tpu as pltpu


def interest_evolving_gru_kernel(
    q_ref, keys_ref, klen_ref, wih_ref, whh_ref, w1f_ref, w2_ref, blob_ref,
    scal_ref, out_ref,
):
    T, B, D = keys_ref.shape
    H = D
    f1, f2 = w2_ref.shape

    q = q_ref[...]                                   # (B, D)
    keys = keys_ref[...]                             # (T, B, D)
    klen = klen_ref[...]                             # (1, B, 1) int32

    # ---- masks built in-kernel (no float-mask inputs, no wrapper HLOs) ----
    t_idx = lax.broadcasted_iota(jnp.int32, (T, B, 1), 0)
    valid = (t_idx < klen).astype(jnp.float32)       # (T, B, 1): t < keys_length[b]
    smp = (klen > 0).astype(jnp.float32)             # (1, B, 1): non-empty rows

    # ---- small packed params (each blob row lane-0 aligned) ----
    b_gr = blob_ref[0:1, :H]      # b_ir + b_hr  (folded)
    b_gz = blob_ref[1:2, :H]      # b_iz + b_hz  (folded)
    b_gn = blob_ref[2:3, :H]      # b_in
    b_hn = blob_ref[3:4, :H]      # b_hn  (cannot be folded: multiplied by r)
    b1 = blob_ref[4:5, :f1]
    b2 = blob_ref[5:6, :f2]
    w3 = blob_ref[6:7, :f2]
    a1 = scal_ref[0]              # Dice alphas + final bias: scalars from SMEM
    a2 = scal_ref[1]
    b3 = scal_ref[2]

    # ---------------- GRU (nn.GRU, batch_first, h0 = 0) ----------------
    # Input-hidden projection for ALL timesteps in one MXU matmul; gate split + bias add
    # hoisted out of the serial recurrence.
    gi_all = jnp.dot(keys.reshape(T * B, D), wih_ref[...],
                     preferred_element_type=jnp.float32).reshape(T, B, 3 * H)
    gi_r = gi_all[:, :, 0:H] + b_gr
    gi_z = gi_all[:, :, H:2 * H] + b_gz
    gi_n = gi_all[:, :, 2 * H:3 * H] + b_gn

    whh_r = whh_ref[0]            # (H, H) each, lane-0 aligned (outer-dim indexing)
    whh_z = whh_ref[1]
    whh_n = whh_ref[2]

    # TODO(synk): for T >> 16 replace the static unroll + stack with lax.fori_loop
    # writing into a VMEM scratch; at T=8 the unroll keeps the recurrence fully visible
    # to the scheduler and 8 live (B,H) vregs are cheap.
    h = jnp.zeros((B, H), jnp.float32)
    hs = []
    for t in range(T):                               # inherently sequential recurrence
        gh_r = jnp.dot(h, whh_r, preferred_element_type=jnp.float32)
        gh_z = jnp.dot(h, whh_z, preferred_element_type=jnp.float32)
        gh_n = jnp.dot(h, whh_n, preferred_element_type=jnp.float32) + b_hn
        r = jax.nn.sigmoid(gi_r[t] + gh_r)
        z = jax.nn.sigmoid(gi_z[t] + gh_z)
        n = jnp.tanh(gi_n[t] + r * gh_n)
        h = (1.0 - z) * n + z * h
        hs.append(h)
    # pad_packed_sequence(padding_value=0): zero outputs at t >= keys_length[b]; this
    # also zeroes every timestep of length-0 rows (the torch zero_outputs path).
    interests = jnp.stack(hs, axis=0) * valid        # (T, B, H)

    # ------------- AttentionPoolingLayer(query, interests, mask=None) -------------
    n_valid = jnp.sum(smp)
    inv_n = 1.0 / jnp.maximum(n_valid, 1.0)
    # TODO(synk): torch.var(unbiased=True) is NaN/undefined for n_valid <= 1; we clamp.
    inv_nm1 = 1.0 / jnp.maximum(n_valid - 1.0, 1.0)

    def dice(x, alpha):
        # x: (T, B, F). Stats over the valid batch rows only; single masked pass
        # (sum and sum-of-squares share one sweep). Matches torch Dice mean/var(dim=0)
        # applied to the filtered batch, eps = 1e-9.
        xm = x * smp
        s1 = jnp.sum(xm, axis=1, keepdims=True)                       # (T, 1, F)
        s2 = jnp.sum(xm * xm, axis=1, keepdims=True)                  # (T, 1, F)
        mu = s1 * inv_n
        var = jnp.maximum((s2 - n_valid * mu * mu) * inv_nm1, 0.0)    # unbiased (ddof=1)
        p = jax.nn.sigmoid((x - mu) * lax.rsqrt(var + 1e-9))
        return alpha * x * (1.0 - p) + x * p

    # Folded first Linear: concat([q, k, q-k, q*k]) @ W1
    #   = q @ (W1_q + W1_qk)  +  [k | q*k] @ [[W1_k - W1_qk], [W1_prod]]
    # w1f rows: [0:D) -> (W1_q + W1_qk), [D:3D) -> stacked ((W1_k - W1_qk), W1_prod).
    q_term = jnp.dot(q, w1f_ref[0:D, :],
                     preferred_element_type=jnp.float32) + b1         # (B, f1), T-invariant
    kq = jnp.concatenate([interests, interests * q[None, :, :]], axis=-1)   # (T, B, 2D)
    h1 = jnp.dot(kq.reshape(T * B, 2 * D), w1f_ref[D:3 * D, :],
                 preferred_element_type=jnp.float32).reshape(T, B, f1)
    h1 = dice(h1 + q_term[None, :, :], a1)                            # (T, B, f1)

    h2 = jnp.dot(h1.reshape(T * B, f1), w2_ref[...],
                 preferred_element_type=jnp.float32).reshape(T, B, f2) + b2
    h2 = dice(h2, a2)                                                 # (T, B, f2)

    # Final Linear(f2 -> 1) as a lane reduce instead of a 1-lane matmul.
    attns = jnp.sum(h2 * w3, axis=-1, keepdims=True) + b3             # (T, B, 1)

    # out[b] = sum_t interests[b, t] * attns[b, t]   (padded / empty rows contribute 0)
    out_ref[...] = jnp.sum(interests * attns, axis=0).astype(out_ref.dtype)


def interest_evolving_gru(query, keys, keys_length, params):
    """query: (B, 1, D), keys: (B, T, D), keys_length: (B, 1) int.  Returns (B, D)."""
    B, T, D = keys.shape
    H = D
    (wih, whh, bih, bhh, w1, b1, a1, w2, b2, a2, w3, b3) = params
    f1, f2 = w2.shape

    # --- tiny wrapper-side layout plumbing + algebraic weight folding (fuses under jit) ---
    q2d = query.reshape(B, D)
    keys_tbd = jnp.transpose(keys, (1, 0, 2))                         # (T, B, D) time-major
    klen = keys_length.reshape(1, B, 1).astype(jnp.int32)

    # GRU hidden weights pre-split per gate -> (3, H, H) (outer-dim indexed in-kernel).
    whh3 = jnp.stack([whh[:, 0:H], whh[:, H:2 * H], whh[:, 2 * H:3 * H]], axis=0)

    # Fold concat([q, k, q-k, q*k]) @ W1.
    w1_q, w1_k, w1_qk, w1_p = w1[0:D], w1[D:2 * D], w1[2 * D:3 * D], w1[3 * D:4 * D]
    w1f = jnp.concatenate([w1_q + w1_qk, w1_k - w1_qk, w1_p], axis=0)  # (3D, f1)

    # All small per-feature vectors packed into ONE lane-aligned blob (one DMA).
    W = max(H, f1, f2)

    def row(v):
        v = v.reshape(1, -1)
        return jnp.pad(v, ((0, 0), (0, W - v.shape[-1])))

    blob = jnp.concatenate([
        row(bih[:, 0:H] + bhh[:, 0:H]),            # r-gate bias (b_ir + b_hr)
        row(bih[:, H:2 * H] + bhh[:, H:2 * H]),    # z-gate bias (b_iz + b_hz)
        row(bih[:, 2 * H:3 * H]),                  # n-gate input bias (b_in)
        row(bhh[:, 2 * H:3 * H]),                  # n-gate hidden bias (b_hn)
        row(b1), row(b2), row(w3),
    ], axis=0)                                     # (7, W)
    scal = jnp.concatenate([a1.reshape(1), a2.reshape(1), b3.reshape(1)])   # (3,) -> SMEM

    # TODO(synk): at production batch sizes add a B-tiled grid with
    # dimension_semantics=("parallel",) (mandatory for v7x's 2nd TensorCore / 64 MiB
    # VMEM); the Dice batch statistics then need a two-pass / cross-block scheme.
    vmem = pl.BlockSpec(memory_space=pltpu.MemorySpace.VMEM)
    smem = pl.BlockSpec(memory_space=pltpu.MemorySpace.SMEM)
    return pl.pallas_call(
        interest_evolving_gru_kernel,
        out_shape=jax.ShapeDtypeStruct((B, D), jnp.float32),
        in_specs=[vmem] * 8 + [smem],
        out_specs=vmem,
    )(q2d, keys_tbd, klen, wih, whh3, w1f, w2, blob, scal)


def init_params(key, input_size, fc_dims=(32, 16)):
    """Deterministic init. GRU weights stored pre-transposed (in_dim, 3H), gates (r,z,n);
    attention-fc weights stored as (in_dim, out_dim); final Linear(f2,1) as a row."""
    D = input_size
    H = D
    f1, f2 = fc_dims
    ks = jax.random.split(key, 12)
    s = 0.1
    wih = s * jax.random.normal(ks[0], (D, 3 * H), jnp.float32)
    whh = s * jax.random.normal(ks[1], (H, 3 * H), jnp.float32)
    bih = s * jax.random.normal(ks[2], (1, 3 * H), jnp.float32)
    bhh = s * jax.random.normal(ks[3], (1, 3 * H), jnp.float32)
    w1 = s * jax.random.normal(ks[4], (4 * D, f1), jnp.float32)
    b1 = s * jax.random.normal(ks[5], (1, f1), jnp.float32)
    a1 = s * jax.random.normal(ks[6], (1, 1), jnp.float32)            # Dice alpha
    w2 = s * jax.random.normal(ks[7], (f1, f2), jnp.float32)
    b2 = s * jax.random.normal(ks[8], (1, f2), jnp.float32)
    a2 = s * jax.random.normal(ks[9], (1, 1), jnp.float32)            # Dice alpha
    w3 = s * jax.random.normal(ks[10], (1, f2), jnp.float32)          # Linear(f2 -> 1)
    b3 = s * jax.random.normal(ks[11], (1, 1), jnp.float32)
    return (wih, whh, bih, bhh, w1, b1, a1, w2, b2, a2, w3, b3)


if __name__ == "__main__":
    # Small shapes implied by the module: batch=8, seq_len=8, hidden=input_size=32.
    B, T, D = 8, 8, 32

    key = jax.random.PRNGKey(0)
    kq, kk, kl, kp = jax.random.split(key, 4)
    query = jax.random.normal(kq, (B, 1, D), jnp.float32)              # [btz, 1, hdsz]
    keys = jax.random.normal(kk, (B, T, D), jnp.float32)               # [btz, seq_len, hdsz]
    keys_length = jax.random.randint(kl, (B, 1), 1, T + 1, jnp.int32)  # [btz, 1], all > 0

    params = init_params(kp, D)

    run = jax.jit(interest_evolving_gru)
    out = run(query, keys, keys_length, params)
    out = jax.block_until_ready(out)
    assert out.shape == (B, D), out.shape
    assert bool(jnp.all(jnp.isfinite(out)))
    print("KERNEL_OK")
</pallas_src>

<mosaic_0001>
module attributes {stable_mosaic.version = 11 : i64} {
  func.func @interest_evolving_gru_kernel(%arg0: memref<8x32xf32, #tpu.memory_space<vmem>>, %arg1: memref<8x8x32xf32, #tpu.memory_space<vmem>>, %arg2: memref<1x8x1xi32, #tpu.memory_space<vmem>>, %arg3: memref<32x96xf32, #tpu.memory_space<vmem>>, %arg4: memref<3x32x32xf32, #tpu.memory_space<vmem>>, %arg5: memref<96x32xf32, #tpu.memory_space<vmem>>, %arg6: memref<32x16xf32, #tpu.memory_space<vmem>>, %arg7: memref<7x32xf32, #tpu.memory_space<vmem>>, %arg8: memref<3xf32, #tpu.memory_space<smem>>, %arg9: memref<8x32xf32, #tpu.memory_space<vmem>>) attributes {dimension_semantics = [], scalar_prefetch = 0 : i64, scratch_operands = 0 : i64, tpu.core_type = #tpu.core_type<tc>} {
    %c0 = arith.constant 0 : index
    %c0_0 = arith.constant 0 : index
    %0 = vector.load %arg0[%c0, %c0_0] : memref<8x32xf32, #tpu.memory_space<vmem>>, vector<8x32xf32>
    %c0_1 = arith.constant 0 : index
    %c0_2 = arith.constant 0 : index
    %c0_3 = arith.constant 0 : index
    %1 = vector.load %arg1[%c0_1, %c0_2, %c0_3] : memref<8x8x32xf32, #tpu.memory_space<vmem>>, vector<8x8x32xf32>
    %c0_4 = arith.constant 0 : index
    %c0_5 = arith.constant 0 : index
    %c0_6 = arith.constant 0 : index
    %2 = vector.load %arg2[%c0_4, %c0_5, %c0_6] : memref<1x8x1xi32, #tpu.memory_space<vmem>>, vector<1x8x1xi32>
    %3 = tpu.iota {dimensions = array<i32: 0>} : vector<8x8x1xi32>
    %4 = vector.broadcast %2 : vector<1x8x1xi32> to vector<8x8x1xi32>
    %5 = arith.cmpi slt, %3, %4 : vector<8x8x1xi32>
    %6 = arith.extui %5 : vector<8x8x1xi1> to vector<8x8x1xi32>
    %7 = arith.sitofp %6 : vector<8x8x1xi32> to vector<8x8x1xf32>
    %c0_i32 = arith.constant 0 : i32
    %8 = vector.broadcast %c0_i32 : i32 to vector<1x8x1xi32>
    %9 = arith.cmpi sgt, %2, %8 : vector<1x8x1xi32>
    %10 = arith.extui %9 : vector<1x8x1xi1> to vector<1x8x1xi32>
    %11 = arith.sitofp %10 : vector<1x8x1xi32> to vector<1x8x1xf32>
    %c0_7 = arith.constant 0 : index
    %c0_8 = arith.constant 0 : index
    %12 = vector.load %arg7[%c0_7, %c0_8] : memref<7x32xf32, #tpu.memory_space<vmem>>, vector<1x32xf32>
    %c1 = arith.constant 1 : index
    %c0_9 = arith.constant 0 : index
    %13 = vector.load %arg7[%c1, %c0_9] : memref<7x32xf32, #tpu.memory_space<vmem>>, vector<1x32xf32>
    %c2 = arith.constant 2 : index
    %c0_10 = arith.constant 0 : index
    %14 = vector.load %arg7[%c2, %c0_10] : memref<7x32xf32, #tpu.memory_space<vmem>>, vector<1x32xf32>
    %c3 = arith.constant 3 : index
    %c0_11 = arith.constant 0 : index
    %15 = vector.load %arg7[%c3, %c0_11] : memref<7x32xf32, #tpu.memory_space<vmem>>, vector<1x32xf32>
    %c4 = arith.constant 4 : index
    %c0_12 = arith.constant 0 : index
    %16 = vector.load %arg7[%c4, %c0_12] : memref<7x32xf32, #tpu.memory_space<vmem>>, vector<1x32xf32>
    %c5 = arith.constant 5 : index
    %c0_13 = arith.constant 0 : index
    %17 = vector.load %arg7[%c5, %c0_13] : memref<7x32xf32, #tpu.memory_space<vmem>>, vector<1x16xf32>
    %c6 = arith.constant 6 : index
    %c0_14 = arith.constant 0 : index
    %18 = vector.load %arg7[%c6, %c0_14] : memref<7x32xf32, #tpu.memory_space<vmem>>, vector<1x16xf32>
    %c0_15 = arith.constant 0 : index
    %19 = memref.load %arg8[%c0_15] : memref<3xf32, #tpu.memory_space<smem>>
    %c1_16 = arith.constant 1 : index
    %20 = memref.load %arg8[%c1_16] : memref<3xf32, #tpu.memory_space<smem>>
    %c2_17 = arith.constant 2 : index
    %21 = memref.load %arg8[%c2_17] : memref<3xf32, #tpu.memory_space<smem>>
    %22 = vector.shape_cast %1 : vector<8x8x32xf32> to vector<64x32xf32>
    %c0_18 = arith.constant 0 : index
    %c0_19 = arith.constant 0 : index
    %23 = vector.load %arg3[%c0_18, %c0_19] : memref<32x96xf32, #tpu.memory_space<vmem>>, vector<32x96xf32>
    %cst = arith.constant dense<0.000000e+00> : vector<64x96xf32>
    %24 = tpu.matmul %22, %23, %cst {dimension_numbers = #tpu.dot_dimension_numbers<[1], [0], [0], [1], [0, 0, 1, 1], [], []>} : vector<64x32xf32>, vector<32x96xf32>, vector<64x96xf32> -> vector<64x96xf32>
    %25 = vector.shape_cast %24 : vector<64x96xf32> to vector<8x8x96xf32>
    %26 = vector.extract_strided_slice %25 {offsets = [0, 0, 0], sizes = [8, 8, 32], strides = [1, 1, 1]} : vector<8x8x96xf32> to vector<8x8x32xf32>
    %27 = vector.shape_cast %12 : vector<1x32xf32> to vector<1x1x32xf32>
    %28 = vector.broadcast %27 : vector<1x1x32xf32> to vector<8x8x32xf32>
    %29 = arith.addf %26, %28 : vector<8x8x32xf32>
    %30 = vector.extract_strided_slice %25 {offsets = [0, 0, 32], sizes = [8, 8, 32], strides = [1, 1, 1]} : vector<8x8x96xf32> to vector<8x8x32xf32>
    %31 = vector.shape_cast %13 : vector<1x32xf32> to vector<1x1x32xf32>
    %32 = vector.broadcast %31 : vector<1x1x32xf32> to vector<8x8x32xf32>
    %33 = arith.addf %30, %32 : vector<8x8x32xf32>
    %34 = vector.extract_strided_slice %25 {offsets = [0, 0, 64], sizes = [8, 8, 32], strides = [1, 1, 1]} : vector<8x8x96xf32> to vector<8x8x32xf32>
    %35 = vector.shape_cast %14 : vector<1x32xf32> to vector<1x1x32xf32>
    %36 = vector.broadcast %35 : vector<1x1x32xf32> to vector<8x8x32xf32>
    %37 = arith.addf %34, %36 : vector<8x8x32xf32>
    %c0_20 = arith.constant 0 : index
    %c0_21 = arith.constant 0 : index
    %c0_22 = arith.constant 0 : index
    %38 = vector.load %arg4[%c0_20, %c0_21, %c0_22] : memref<3x32x32xf32, #tpu.memory_space<vmem>>, vector<1x32x32xf32>
    %39 = vector.shape_cast %38 : vector<1x32x32xf32> to vector<32x32xf32>
    %c1_23 = arith.constant 1 : index
    %c0_24 = arith.constant 0 : index
    %c0_25 = arith.constant 0 : index
    %40 = vector.load %arg4[%c1_23, %c0_24, %c0_25] : memref<3x32x32xf32, #tpu.memory_space<vmem>>, vector<1x32x32xf32>
    %41 = vector.shape_cast %40 : vector<1x32x32xf32> to vector<32x32xf32>
    %c2_26 = arith.constant 2 : index
    %c0_27 = arith.constant 0 : index
    %c0_28 = arith.constant 0 : index
    %42 = vector.load %arg4[%c2_26, %c0_27, %c0_28] : memref<3x32x32xf32, #tpu.memory_space<vmem>>, vector<1x32x32xf32>
    %43 = vector.shape_cast %42 : vector<1x32x32xf32> to vector<32x32xf32>
    %cst_29 = arith.constant 0.000000e+00 : f32
    %44 = vector.broadcast %cst_29 : f32 to vector<8x32xf32>
    %cst_30 = arith.constant dense<0.000000e+00> : vector<8x32xf32>
    %45 = tpu.matmul %44, %39, %cst_30 {dimension_numbers = #tpu.dot_dimension_numbers<[1], [0], [0], [1], [0, 0, 1, 1], [], []>} : vector<8x32xf32>, vector<32x32xf32>, vector<8x32xf32> -> vector<8x32xf32>
    %cst_31 = arith.constant dense<0.000000e+00> : vector<8x32xf32>
    %46 = tpu.matmul %44, %41, %cst_31 {dimension_numbers = #tpu.dot_dimension_numbers<[1], [0], [0], [1], [0, 0, 1, 1], [], []>} : vector<8x32xf32>, vector<32x32xf32>, vector<8x32xf32> -> vector<8x32xf32>
    %cst_32 = arith.constant dense<0.000000e+00> : vector<8x32xf32>
    %47 = tpu.matmul %44, %43, %cst_32 {dimension_numbers = #tpu.dot_dimension_numbers<[1], [0], [0], [1], [0, 0, 1, 1], [], []>} : vector<8x32xf32>, vector<32x32xf32>, vector<8x32xf32> -> vector<8x32xf32>
    %48 = vector.broadcast %15 : vector<1x32xf32> to vector<8x32xf32>
    %49 = arith.addf %47, %48 : vector<8x32xf32>
    %50 = vector.extract_strided_slice %29 {offsets = [0, 0, 0], sizes = [1, 8, 32], strides = [1, 1, 1]} : vector<8x8x32xf32> to vector<1x8x32xf32>
    %51 = vector.shape_cast %50 : vector<1x8x32xf32> to vector<8x32xf32>
    %52 = arith.addf %51, %45 : vector<8x32xf32>
    %53 = arith.negf %52 : vector<8x32xf32>
    %54 = math.exp %53 : vector<8x32xf32>
    %cst_33 = arith.constant 1.000000e+00 : f32
    %55 = vector.broadcast %cst_33 : f32 to vector<8x32xf32>
    %56 = arith.addf %55, %54 : vector<8x32xf32>
    %57 = arith.divf %55, %56 : vector<8x32xf32>
    %58 = vector.extract_strided_slice %33 {offsets = [0, 0, 0], sizes = [1, 8, 32], strides = [1, 1, 1]} : vector<8x8x32xf32> to vector<1x8x32xf32>
    %59 = vector.shape_cast %58 : vector<1x8x32xf32> to vector<8x32xf32>
    %60 = arith.addf %59, %46 : vector<8x32xf32>
    %61 = arith.negf %60 : vector<8x32xf32>
    %62 = math.exp %61 : vector<8x32xf32>
    %cst_34 = arith.constant 1.000000e+00 : f32
    %63 = vector.broadcast %cst_34 : f32 to vector<8x32xf32>
    %64 = arith.addf %63, %62 : vector<8x32xf32>
    %65 = arith.divf %63, %64 : vector<8x32xf32>
    %66 = vector.extract_strided_slice %37 {offsets = [0, 0, 0], sizes = [1, 8, 32], strides = [1, 1, 1]} : vector<8x8x32xf32> to vector<1x8x32xf32>
    %67 = vector.shape_cast %66 : vector<1x8x32xf32> to vector<8x32xf32>
    %68 = arith.mulf %57, %49 : vector<8x32xf32>
    %69 = arith.addf %67, %68 : vector<8x32xf32>
    %70 = math.tanh %69 : vector<8x32xf32>
    %cst_35 = arith.constant 1.000000e+00 : f32
    %71 = vector.broadcast %cst_35 : f32 to vector<8x32xf32>
    %72 = arith.subf %71, %65 : vector<8x32xf32>
    %73 = arith.mulf %72, %70 : vector<8x32xf32>
    %74 = arith.mulf %65, %44 : vector<8x32xf32>
    %75 = arith.addf %73, %74 : vector<8x32xf32>
    %cst_36 = arith.constant dense<0.000000e+00> : vector<8x32xf32>
    %76 = tpu.matmul %75, %39, %cst_36 {dimension_numbers = #tpu.dot_dimension_numbers<[1], [0], [0], [1], [0, 0, 1, 1], [], []>} : vector<8x32xf32>, vector<32x32xf32>, vector<8x32xf32> -> vector<8x32xf32>
    %cst_37 = arith.constant dense<0.000000e+00> : vector<8x32xf32>
    %77 = tpu.matmul %75, %41, %cst_37 {dimension_numbers = #tpu.dot_dimension_numbers<[1], [0], [0], [1], [0, 0, 1, 1], [], []>} : vector<8x32xf32>, vector<32x32xf32>, vector<8x32xf32> -> vector<8x32xf32>
    %cst_38 = arith.constant dense<0.000000e+00> : vector<8x32xf32>
    %78 = tpu.matmul %75, %43, %cst_38 {dimension_numbers = #tpu.dot_dimension_numbers<[1], [0], [0], [1], [0, 0, 1, 1], [], []>} : vector<8x32xf32>, vector<32x32xf32>, vector<8x32xf32> -> vector<8x32xf32>
    %79 = vector.broadcast %15 : vector<1x32xf32> to vector<8x32xf32>
    %80 = arith.addf %78, %79 : vector<8x32xf32>
    %81 = vector.extract_strided_slice %29 {offsets = [1, 0, 0], sizes = [1, 8, 32], strides = [1, 1, 1]} : vector<8x8x32xf32> to vector<1x8x32xf32>
    %82 = vector.shape_cast %81 : vector<1x8x32xf32> to vector<8x32xf32>
    %83 = arith.addf %82, %76 : vector<8x32xf32>
    %84 = arith.negf %83 : vector<8x32xf32>
    %85 = math.exp %84 : vector<8x32xf32>
    %cst_39 = arith.constant 1.000000e+00 : f32
    %86 = vector.broadcast %cst_39 : f32 to vector<8x32xf32>
    %87 = arith.addf %86, %85 : vector<8x32xf32>
    %88 = arith.divf %86, %87 : vector<8x32xf32>
    %89 = vector.extract_strided_slice %33 {offsets = [1, 0, 0], sizes = [1, 8, 32], strides = [1, 1, 1]} : vector<8x8x32xf32> to vector<1x8x32xf32>
    %90 = vector.shape_cast %89 : vector<1x8x32xf32> to vector<8x32xf32>
    %91 = arith.addf %90, %77 : vector<8x32xf32>
    %92 = arith.negf %91 : vector<8x32xf32>
    %93 = math.exp %92 : vector<8x32xf32>
    %cst_40 = arith.constant 1.000000e+00 : f32
    %94 = vector.broadcast %cst_40 : f32 to vector<8x32xf32>
    %95 = arith.addf %94, %93 : vector<8x32xf32>
    %96 = arith.divf %94, %95 : vector<8x32xf32>
    %97 = vector.extract_strided_slice %37 {offsets = [1, 0, 0], sizes = [1, 8, 32], strides = [1, 1, 1]} : vector<8x8x32xf32> to vector<1x8x32xf32>
    %98 = vector.shape_cast %97 : vector<1x8x32xf32> to vector<8x32xf32>
    %99 = arith.mulf %88, %80 : vector<8x32xf32>
    %100 = arith.addf %98, %99 : vector<8x32xf32>
    %101 = math.tanh %100 : vector<8x32xf32>
    %cst_41 = arith.constant 1.000000e+00 : f32
    %102 = vector.broadcast %cst_41 : f32 to vector<8x32xf32>
    %103 = arith.subf %102, %96 : vector<8x32xf32>
    %104 = arith.mulf %103, %101 : vector<8x32xf32>
    %105 = arith.mulf %96, %75 : vector<8x32xf32>
    %106 = arith.addf %104, %105 : vector<8x32xf32>
    %cst_42 = arith.constant dense<0.000000e+00> : vector<8x32xf32>
    %107 = tpu.matmul %106, %39, %cst_42 {dimension_numbers = #tpu.dot_dimension_numbers<[1], [0], [0], [1], [0, 0, 1, 1], [], []>} : vector<8x32xf32>, vector<32x32xf32>, vector<8x32xf32> -> vector<8x32xf32>
    %cst_43 = arith.constant dense<0.000000e+00> : vector<8x32xf32>
    %108 = tpu.matmul %106, %41, %cst_43 {dimension_numbers = #tpu.dot_dimension_numbers<[1], [0], [0], [1], [0, 0, 1, 1], [], []>} : vector<8x32xf32>, vector<32x32xf32>, vector<8x32xf32> -> vector<8x32xf32>
    %cst_44 = arith.constant dense<0.000000e+00> : vector<8x32xf32>
    %109 = tpu.matmul %106, %43, %cst_44 {dimension_numbers = #tpu.dot_dimension_numbers<[1], [0], [0], [1], [0, 0, 1, 1], [], []>} : vector<8x32xf32>, vector<32x32xf32>, vector<8x32xf32> -> vector<8x32xf32>
    %110 = vector.broadcast %15 : vector<1x32xf32> to vector<8x32xf32>
    %111 = arith.addf %109, %110 : vector<8x32xf32>
    %112 = vector.extract_strided_slice %29 {offsets = [2, 0, 0], sizes = [1, 8, 32], strides = [1, 1, 1]} : vector<8x8x32xf32> to vector<1x8x32xf32>
    %113 = vector.shape_cast %112 : vector<1x8x32xf32> to vector<8x32xf32>
    %114 = arith.addf %113, %107 : vector<8x32xf32>
    %115 = arith.negf %114 : vector<8x32xf32>
    %116 = math.exp %115 : vector<8x32xf32>
    %cst_45 = arith.constant 1.000000e+00 : f32
    %117 = vector.broadcast %cst_45 : f32 to vector<8x32xf32>
    %118 = arith.addf %117, %116 : vector<8x32xf32>
    %119 = arith.divf %117, %118 : vector<8x32xf32>
    %120 = vector.extract_strided_slice %33 {offsets = [2, 0, 0], sizes = [1, 8, 32], strides = [1, 1, 1]} : vector<8x8x32xf32> to vector<1x8x32xf32>
    %121 = vector.shape_cast %120 : vector<1x8x32xf32> to vector<8x32xf32>
    %122 = arith.addf %121, %108 : vector<8x32xf32>
    %123 = arith.negf %122 : vector<8x32xf32>
    %124 = math.exp %123 : vector<8x32xf32>
    %cst_46 = arith.constant 1.000000e+00 : f32
    %125 = vector.broadcast %cst_46 : f32 to vector<8x32xf32>
    %126 = arith.addf %125, %124 : vector<8x32xf32>
    %127 = arith.divf %125, %126 : vector<8x32xf32>
    %128 = vector.extract_strided_slice %37 {offsets = [2, 0, 0], sizes = [1, 8, 32], strides = [1, 1, 1]} : vector<8x8x32xf32> to vector<1x8x32xf32>
    %129 = vector.shape_cast %128 : vector<1x8x32xf32> to vector<8x32xf32>
    %130 = arith.mulf %119, %111 : vector<8x32xf32>
    %131 = arith.addf %129, %130 : vector<8x32xf32>
    %132 = math.tanh %131 : vector<8x32xf32>
    %cst_47 = arith.constant 1.000000e+00 : f32
    %133 = vector.broadcast %cst_47 : f32 to vector<8x32xf32>
    %134 = arith.subf %133, %127 : vector<8x32xf32>
    %135 = arith.mulf %134, %132 : vector<8x32xf32>
    %136 = arith.mulf %127, %106 : vector<8x32xf32>
    %137 = arith.addf %135, %136 : vector<8x32xf32>
    %cst_48 = arith.constant dense<0.000000e+00> : vector<8x32xf32>
    %138 = tpu.matmul %137, %39, %cst_48 {dimension_numbers = #tpu.dot_dimension_numbers<[1], [0], [0], [1], [0, 0, 1, 1], [], []>} : vector<8x32xf32>, vector<32x32xf32>, vector<8x32xf32> -> vector<8x32xf32>
    %cst_49 = arith.constant dense<0.000000e+00> : vector<8x32xf32>
    %139 = tpu.matmul %137, %41, %cst_49 {dimension_numbers = #tpu.dot_dimension_numbers<[1], [0], [0], [1], [0, 0, 1, 1], [], []>} : vector<8x32xf32>, vector<32x32xf32>, vector<8x32xf32> -> vector<8x32xf32>
    %cst_50 = arith.constant dense<0.000000e+00> : vector<8x32xf32>
    %140 = tpu.matmul %137, %43, %cst_50 {dimension_numbers = #tpu.dot_dimension_numbers<[1], [0], [0], [1], [0, 0, 1, 1], [], []>} : vector<8x32xf32>, vector<32x32xf32>, vector<8x32xf32> -> vector<8x32xf32>
    %141 = vector.broadcast %15 : vector<1x32xf32> to vector<8x32xf32>
    %142 = arith.addf %140, %141 : vector<8x32xf32>
    %143 = vector.extract_strided_slice %29 {offsets = [3, 0, 0], sizes = [1, 8, 32], strides = [1, 1, 1]} : vector<8x8x32xf32> to vector<1x8x32xf32>
    %144 = vector.shape_cast %143 : vector<1x8x32xf32> to vector<8x32xf32>
    %145 = arith.addf %144, %138 : vector<8x32xf32>
    %146 = arith.negf %145 : vector<8x32xf32>
    %147 = math.exp %146 : vector<8x32xf32>
    %cst_51 = arith.constant 1.000000e+00 : f32
    %148 = vector.broadcast %cst_51 : f32 to vector<8x32xf32>
    %149 = arith.addf %148, %147 : vector<8x32xf32>
    %150 = arith.divf %148, %149 : vector<8x32xf32>
    %151 = vector.extract_strided_slice %33 {offsets = [3, 0, 0], sizes = [1, 8, 32], strides = [1, 1, 1]} : vector<8x8x32xf32> to vector<1x8x32xf32>
    %152 = vector.shape_cast %151 : vector<1x8x32xf32> to vector<8x32xf32>
    %153 = arith.addf %152, %139 : vector<8x32xf32>
    %154 = arith.negf %153 : vector<8x32xf32>
    %155 = math.exp %154 : vector<8x32xf32>
    %cst_52 = arith.constant 1.000000e+00 : f32
    %156 = vector.broadcast %cst_52 : f32 to vector<8x32xf32>
    %157 = arith.addf %156, %155 : vector<8x32xf32>
    %158 = arith.divf %156, %157 : vector<8x32xf32>
    %159 = vector.extract_strided_slice %37 {offsets = [3, 0, 0], sizes = [1, 8, 32], strides = [1, 1, 1]} : vector<8x8x32xf32> to vector<1x8x32xf32>
    %160 = vector.shape_cast %159 : vector<1x8x32xf32> to vector<8x32xf32>
    %161 = arith.mulf %150, %142 : vector<8x32xf32>
    %162 = arith.addf %160, %161 : vector<8x32xf32>
    %163 = math.tanh %162 : vector<8x32xf32>
    %cst_53 = arith.constant 1.000000e+00 : f32
    %164 = vector.broadcast %cst_53 : f32 to vector<8x32xf32>
    %165 = arith.subf %164, %158 : vector<8x32xf32>
    %166 = arith.mulf %165, %163 : vector<8x32xf32>
    %167 = arith.mulf %158, %137 : vector<8x32xf32>
    %168 = arith.addf %166, %167 : vector<8x32xf32>
    %cst_54 = arith.constant dense<0.000000e+00> : vector<8x32xf32>
    %169 = tpu.matmul %168, %39, %cst_54 {dimension_numbers = #tpu.dot_dimension_numbers<[1], [0], [0], [1], [0, 0, 1, 1], [], []>} : vector<8x32xf32>, vector<32x32xf32>, vector<8x32xf32> -> vector<8x32xf32>
    %cst_55 = arith.constant dense<0.000000e+00> : vector<8x32xf32>
    %170 = tpu.matmul %168, %41, %cst_55 {dimension_numbers = #tpu.dot_dimension_numbers<[1], [0], [0], [1], [0, 0, 1, 1], [], []>} : vector<8x32xf32>, vector<32x32xf32>, vector<8x32xf32> -> vector<8x32xf32>
    %cst_56 = arith.constant dense<0.000000e+00> : vector<8x32xf32>
    %171 = tpu.matmul %168, %43, %cst_56 {dimension_numbers = #tpu.dot_dimension_numbers<[1], [0], [0], [1], [0, 0, 1, 1], [], []>} : vector<8x32xf32>, vector<32x32xf32>, vector<8x32xf32> -> vector<8x32xf32>
    %172 = vector.broadcast %15 : vector<1x32xf32> to vector<8x32xf32>
    %173 = arith.addf %171, %172 : vector<8x32xf32>
    %174 = vector.extract_strided_slice %29 {offsets = [4, 0, 0], sizes = [1, 8, 32], strides = [1, 1, 1]} : vector<8x8x32xf32> to vector<1x8x32xf32>
    %175 = vector.shape_cast %174 : vector<1x8x32xf32> to vector<8x32xf32>
    %176 = arith.addf %175, %169 : vector<8x32xf32>
    %177 = arith.negf %176 : vector<8x32xf32>
    %178 = math.exp %177 : vector<8x32xf32>
    %cst_57 = arith.constant 1.000000e+00 : f32
    %179 = vector.broadcast %cst_57 : f32 to vector<8x32xf32>
    %180 = arith.addf %179, %178 : vector<8x32xf32>
    %181 = arith.divf %179, %180 : vector<8x32xf32>
    %182 = vector.extract_strided_slice %33 {offsets = [4, 0, 0], sizes = [1, 8, 32], strides = [1, 1, 1]} : vector<8x8x32xf32> to vector<1x8x32xf32>
    %183 = vector.shape_cast %182 : vector<1x8x32xf32> to vector<8x32xf32>
    %184 = arith.addf %183, %170 : vector<8x32xf32>
    %185 = arith.negf %184 : vector<8x32xf32>
    %186 = math.exp %185 : vector<8x32xf32>
    %cst_58 = arith.constant 1.000000e+00 : f32
    %187 = vector.broadcast %cst_58 : f32 to vector<8x32xf32>
    %188 = arith.addf %187, %186 : vector<8x32xf32>
    %189 = arith.divf %187, %188 : vector<8x32xf32>
    %190 = vector.extract_strided_slice %37 {offsets = [4, 0, 0], sizes = [1, 8, 32], strides = [1, 1, 1]} : vector<8x8x32xf32> to vector<1x8x32xf32>
    %191 = vector.shape_cast %190 : vector<1x8x32xf32> to vector<8x32xf32>
    %192 = arith.mulf %181, %173 : vector<8x32xf32>
    %193 = arith.addf %191, %192 : vector<8x32xf32>
    %194 = math.tanh %193 : vector<8x32xf32>
    %cst_59 = arith.constant 1.000000e+00 : f32
    %195 = vector.broadcast %cst_59 : f32 to vector<8x32xf32>
    %196 = arith.subf %195, %189 : vector<8x32xf32>
    %197 = arith.mulf %196, %194 : vector<8x32xf32>
    %198 = arith.mulf %189, %168 : vector<8x32xf32>
    %199 = arith.addf %197, %198 : vector<8x32xf32>
    %cst_60 = arith.constant dense<0.000000e+00> : vector<8x32xf32>
    %200 = tpu.matmul %199, %39, %cst_60 {dimension_numbers = #tpu.dot_dimension_numbers<[1], [0], [0], [1], [0, 0, 1, 1], [], []>} : vector<8x32xf32>, vector<32x32xf32>, vector<8x32xf32> -> vector<8x32xf32>
    %cst_61 = arith.constant dense<0.000000e+00> : vector<8x32xf32>
    %201 = tpu.matmul %199, %41, %cst_61 {dimension_numbers = #tpu.dot_dimension_numbers<[1], [0], [0], [1], [0, 0, 1, 1], [], []>} : vector<8x32xf32>, vector<32x32xf32>, vector<8x32xf32> -> vector<8x32xf32>
    %cst_62 = arith.constant dense<0.000000e+00> : vector<8x32xf32>
    %202 = tpu.matmul %199, %43, %cst_62 {dimension_numbers = #tpu.dot_dimension_numbers<[1], [0], [0], [1], [0, 0, 1, 1], [], []>} : vector<8x32xf32>, vector<32x32xf32>, vector<8x32xf32> -> vector<8x32xf32>
    %203 = vector.broadcast %15 : vector<1x32xf32> to vector<8x32xf32>
    %204 = arith.addf %202, %203 : vector<8x32xf32>
    %205 = vector.extract_strided_slice %29 {offsets = [5, 0, 0], sizes = [1, 8, 32], strides = [1, 1, 1]} : vector<8x8x32xf32> to vector<1x8x32xf32>
    %206 = vector.shape_cast %205 : vector<1x8x32xf32> to vector<8x32xf32>
    %207 = arith.addf %206, %200 : vector<8x32xf32>
    %208 = arith.negf %207 : vector<8x32xf32>
    %209 = math.exp %208 : vector<8x32xf32>
    %cst_63 = arith.constant 1.000000e+00 : f32
    %210 = vector.broadcast %cst_63 : f32 to vector<8x32xf32>
    %211 = arith.addf %210, %209 : vector<8x32xf32>
    %212 = arith.divf %210, %211 : vector<8x32xf32>
    %213 = vector.extract_strided_slice %33 {offsets = [5, 0, 0], sizes = [1, 8, 32], strides = [1, 1, 1]} : vector<8x8x32xf32> to vector<1x8x32xf32>
    %214 = vector.shape_cast %213 : vector<1x8x32xf32> to vector<8x32xf32>
    %215 = arith.addf %214, %201 : vector<8x32xf32>
    %216 = arith.negf %215 : vector<8x32xf32>
    %217 = math.exp %216 : vector<8x32xf32>
    %cst_64 = arith.constant 1.000000e+00 : f32
    %218 = vector.broadcast %cst_64 : f32 to vector<8x32xf32>
    %219 = arith.addf %218, %217 : vector<8x32xf32>
    %220 = arith.divf %218, %219 : vector<8x32xf32>
    %221 = vector.extract_strided_slice %37 {offsets = [5, 0, 0], sizes = [1, 8, 32], strides = [1, 1, 1]} : vector<8x8x32xf32> to vector<1x8x32xf32>
    %222 = vector.shape_cast %221 : vector<1x8x32xf32> to vector<8x32xf32>
    %223 = arith.mulf %212, %204 : vector<8x32xf32>
    %224 = arith.addf %222, %223 : vector<8x32xf32>
    %225 = math.tanh %224 : vector<8x32xf32>
    %cst_65 = arith.constant 1.000000e+00 : f32
    %226 = vector.broadcast %cst_65 : f32 to vector<8x32xf32>
    %227 = arith.subf %226, %220 : vector<8x32xf32>
    %228 = arith.mulf %227, %225 : vector<8x32xf32>
    %229 = arith.mulf %220, %199 : vector<8x32xf32>
    %230 = arith.addf %228, %229 : vector<8x32xf32>
    %cst_66 = arith.constant dense<0.000000e+00> : vector<8x32xf32>
    %231 = tpu.matmul %230, %39, %cst_66 {dimension_numbers = #tpu.dot_dimension_numbers<[1], [0], [0], [1], [0, 0, 1, 1], [], []>} : vector<8x32xf32>, vector<32x32xf32>, vector<8x32xf32> -> vector<8x32xf32>
    %cst_67 = arith.constant dense<0.000000e+00> : vector<8x32xf32>
    %232 = tpu.matmul %230, %41, %cst_67 {dimension_numbers = #tpu.dot_dimension_numbers<[1], [0], [0], [1], [0, 0, 1, 1], [], []>} : vector<8x32xf32>, vector<32x32xf32>, vector<8x32xf32> -> vector<8x32xf32>
    %cst_68 = arith.constant dense<0.000000e+00> : vector<8x32xf32>
    %233 = tpu.matmul %230, %43, %cst_68 {dimension_numbers = #tpu.dot_dimension_numbers<[1], [0], [0], [1], [0, 0, 1, 1], [], []>} : vector<8x32xf32>, vector<32x32xf32>, vector<8x32xf32> -> vector<8x32xf32>
    %234 = vector.broadcast %15 : vector<1x32xf32> to vector<8x32xf32>
    %235 = arith.addf %233, %234 : vector<8x32xf32>
    %236 = vector.extract_strided_slice %29 {offsets = [6, 0, 0], sizes = [1, 8, 32], strides = [1, 1, 1]} : vector<8x8x32xf32> to vector<1x8x32xf32>
    %237 = vector.shape_cast %236 : vector<1x8x32xf32> to vector<8x32xf32>
    %238 = arith.addf %237, %231 : vector<8x32xf32>
    %239 = arith.negf %238 : vector<8x32xf32>
    %240 = math.exp %239 : vector<8x32xf32>
    %cst_69 = arith.constant 1.000000e+00 : f32
    %241 = vector.broadcast %cst_69 : f32 to vector<8x32xf32>
    %242 = arith.addf %241, %240 : vector<8x32xf32>
    %243 = arith.divf %241, %242 : vector<8x32xf32>
    %244 = vector.extract_strided_slice %33 {offsets = [6, 0, 0], sizes = [1, 8, 32], strides = [1, 1, 1]} : vector<8x8x32xf32> to vector<1x8x32xf32>
    %245 = vector.shape_cast %244 : vector<1x8x32xf32> to vector<8x32xf32>
    %246 = arith.addf %245, %232 : vector<8x32xf32>
    %247 = arith.negf %246 : vector<8x32xf32>
    %248 = math.exp %247 : vector<8x32xf32>
    %cst_70 = arith.constant 1.000000e+00 : f32
    %249 = vector.broadcast %cst_70 : f32 to vector<8x32xf32>
    %250 = arith.addf %249, %248 : vector<8x32xf32>
    %251 = arith.divf %249, %250 : vector<8x32xf32>
    %252 = vector.extract_strided_slice %37 {offsets = [6, 0, 0], sizes = [1, 8, 32], strides = [1, 1, 1]} : vector<8x8x32xf32> to vector<1x8x32xf32>
    %253 = vector.shape_cast %252 : vector<1x8x32xf32> to vector<8x32xf32>
    %254 = arith.mulf %243, %235 : vector<8x32xf32>
    %255 = arith.addf %253, %254 : vector<8x32xf32>
    %256 = math.tanh %255 : vector<8x32xf32>
    %cst_71 = arith.constant 1.000000e+00 : f32
    %257 = vector.broadcast %cst_71 : f32 to vector<8x32xf32>
    %258 = arith.subf %257, %251 : vector<8x32xf32>
    %259 = arith.mulf %258, %256 : vector<8x32xf32>
    %260 = arith.mulf %251, %230 : vector<8x32xf32>
    %261 = arith.addf %259, %260 : vector<8x32xf32>
    %cst_72 = arith.constant dense<0.000000e+00> : vector<8x32xf32>
    %262 = tpu.matmul %261, %39, %cst_72 {dimension_numbers = #tpu.dot_dimension_numbers<[1], [0], [0], [1], [0, 0, 1, 1], [], []>} : vector<8x32xf32>, vector<32x32xf32>, vector<8x32xf32> -> vector<8x32xf32>
    %cst_73 = arith.constant dense<0.000000e+00> : vector<8x32xf32>
    %263 = tpu.matmul %261, %41, %cst_73 {dimension_numbers = #tpu.dot_dimension_numbers<[1], [0], [0], [1], [0, 0, 1, 1], [], []>} : vector<8x32xf32>, vector<32x32xf32>, vector<8x32xf32> -> vector<8x32xf32>
    %cst_74 = arith.constant dense<0.000000e+00> : vector<8x32xf32>
    %264 = tpu.matmul %261, %43, %cst_74 {dimension_numbers = #tpu.dot_dimension_numbers<[1], [0], [0], [1], [0, 0, 1, 1], [], []>} : vector<8x32xf32>, vector<32x32xf32>, vector<8x32xf32> -> vector<8x32xf32>
    %265 = vector.broadcast %15 : vector<1x32xf32> to vector<8x32xf32>
    %266 = arith.addf %264, %265 : vector<8x32xf32>
    %267 = vector.extract_strided_slice %29 {offsets = [7, 0, 0], sizes = [1, 8, 32], strides = [1, 1, 1]} : vector<8x8x32xf32> to vector<1x8x32xf32>
    %268 = vector.shape_cast %267 : vector<1x8x32xf32> to vector<8x32xf32>
    %269 = arith.addf %268, %262 : vector<8x32xf32>
    %270 = arith.negf %269 : vector<8x32xf32>
    %271 = math.exp %270 : vector<8x32xf32>
    %cst_75 = arith.constant 1.000000e+00 : f32
    %272 = vector.broadcast %cst_75 : f32 to vector<8x32xf32>
    %273 = arith.addf %272, %271 : vector<8x32xf32>
    %274 = arith.divf %272, %273 : vector<8x32xf32>
    %275 = vector.extract_strided_slice %33 {offsets = [7, 0, 0], sizes = [1, 8, 32], strides = [1, 1, 1]} : vector<8x8x32xf32> to vector<1x8x32xf32>
    %276 = vector.shape_cast %275 : vector<1x8x32xf32> to vector<8x32xf32>
    %277 = arith.addf %276, %263 : vector<8x32xf32>
    %278 = arith.negf %277 : vector<8x32xf32>
    %279 = math.exp %278 : vector<8x32xf32>
    %cst_76 = arith.constant 1.000000e+00 : f32
    %280 = vector.broadcast %cst_76 : f32 to vector<8x32xf32>
    %281 = arith.addf %280, %279 : vector<8x32xf32>
    %282 = arith.divf %280, %281 : vector<8x32xf32>
    %283 = vector.extract_strided_slice %37 {offsets = [7, 0, 0], sizes = [1, 8, 32], strides = [1, 1, 1]} : vector<8x8x32xf32> to vector<1x8x32xf32>
    %284 = vector.shape_cast %283 : vector<1x8x32xf32> to vector<8x32xf32>
    %285 = arith.mulf %274, %266 : vector<8x32xf32>
    %286 = arith.addf %284, %285 : vector<8x32xf32>
    %287 = math.tanh %286 : vector<8x32xf32>
    %cst_77 = arith.constant 1.000000e+00 : f32
    %288 = vector.broadcast %cst_77 : f32 to vector<8x32xf32>
    %289 = arith.subf %288, %282 : vector<8x32xf32>
    %290 = arith.mulf %289, %287 : vector<8x32xf32>
    %291 = arith.mulf %282, %261 : vector<8x32xf32>
    %292 = arith.addf %290, %291 : vector<8x32xf32>
    %293 = vector.shape_cast %75 : vector<8x32xf32> to vector<1x8x32xf32>
    %294 = vector.shape_cast %106 : vector<8x32xf32> to vector<1x8x32xf32>
    %295 = vector.shape_cast %137 : vector<8x32xf32> to vector<1x8x32xf32>
    %296 = vector.shape_cast %168 : vector<8x32xf32> to vector<1x8x32xf32>
    %297 = vector.shape_cast %199 : vector<8x32xf32> to vector<1x8x32xf32>
    %298 = vector.shape_cast %230 : vector<8x32xf32> to vector<1x8x32xf32>
    %299 = vector.shape_cast %261 : vector<8x32xf32> to vector<1x8x32xf32>
    %300 = vector.shape_cast %292 : vector<8x32xf32> to vector<1x8x32xf32>
    %301 = tpu.concatenate %293, %294, %295, %296, %297, %298, %299, %300 in 0 : vector<1x8x32xf32>, vector<1x8x32xf32>, vector<1x8x32xf32>, vector<1x8x32xf32>, vector<1x8x32xf32>, vector<1x8x32xf32>, vector<1x8x32xf32>, vector<1x8x32xf32> -> vector<8x8x32xf32>
    %302 = vector.broadcast %7 : vector<8x8x1xf32> to vector<8x8x32xf32>
    %303 = arith.mulf %301, %302 : vector<8x8x32xf32>
    %304 = vector.shape_cast %11 : vector<1x8x1xf32> to vector<1x1x8x1xf32>
    %cst_78 = arith.constant dense<0.000000e+00> : vector<1xf32>
    %305 = vector.multi_reduction <add>, %304, %cst_78 [1, 2, 3] : vector<1x1x8x1xf32> to vector<1xf32>
    %306 = vector.shape_cast %305 : vector<1xf32> to vector<1x1x1x1xf32>
    %307 = vector.extract %306[0, 0, 0, 0] : f32 from vector<1x1x1x1xf32>
    %cst_79 = arith.constant 1.000000e+00 : f32
    %308 = arith.maximumf %307, %cst_79 : f32
    %cst_80 = arith.constant 1.000000e+00 : f32
    %309 = arith.divf %cst_80, %308 : f32
    %cst_81 = arith.constant 1.000000e+00 : f32
    %310 = arith.subf %307, %cst_81 : f32
    %cst_82 = arith.constant 1.000000e+00 : f32
    %311 = arith.maximumf %310, %cst_82 : f32
    %cst_83 = arith.constant 1.000000e+00 : f32
    %312 = arith.divf %cst_83, %311 : f32
    %c0_84 = arith.constant 0 : index
    %c0_85 = arith.constant 0 : index
    %313 = vector.load %arg5[%c0_84, %c0_85] : memref<96x32xf32, #tpu.memory_space<vmem>>, vector<32x32xf32>
    %cst_86 = arith.constant dense<0.000000e+00> : vector<8x32xf32>
    %314 = tpu.matmul %0, %313, %cst_86 {dimension_numbers = #tpu.dot_dimension_numbers<[1], [0], [0], [1], [0, 0, 1, 1], [], []>} : vector<8x32xf32>, vector<32x32xf32>, vector<8x32xf32> -> vector<8x32xf32>
    %315 = vector.broadcast %16 : vector<1x32xf32> to vector<8x32xf32>
    %316 = arith.addf %314, %315 : vector<8x32xf32>
    %317 = vector.shape_cast %0 : vector<8x32xf32> to vector<1x8x32xf32>
    %318 = vector.broadcast %317 : vector<1x8x32xf32> to vector<8x8x32xf32>
    %319 = arith.mulf %303, %318 : vector<8x8x32xf32>
    %320 = tpu.concatenate %303, %319 in 2 : vector<8x8x32xf32>, vector<8x8x32xf32> -> vector<8x8x64xf32>
    %321 = vector.shape_cast %320 : vector<8x8x64xf32> to vector<64x64xf32>
    %c32 = arith.constant 32 : index
    %c0_87 = arith.constant 0 : index
    %322 = vector.load %arg5[%c32, %c0_87] : memref<96x32xf32, #tpu.memory_space<vmem>>, vector<64x32xf32>
    %cst_88 = arith.constant dense<0.000000e+00> : vector<64x32xf32>
    %323 = tpu.matmul %321, %322, %cst_88 {dimension_numbers = #tpu.dot_dimension_numbers<[1], [0], [0], [1], [0, 0, 1, 1], [], []>} : vector<64x64xf32>, vector<64x32xf32>, vector<64x32xf32> -> vector<64x32xf32>
    %324 = vector.shape_cast %323 : vector<64x32xf32> to vector<8x8x32xf32>
    %325 = vector.shape_cast %316 : vector<8x32xf32> to vector<1x8x32xf32>
    %326 = vector.broadcast %325 : vector<1x8x32xf32> to vector<8x8x32xf32>
    %327 = arith.addf %324, %326 : vector<8x8x32xf32>
    %328 = vector.broadcast %11 : vector<1x8x1xf32> to vector<8x8x32xf32>
    %329 = arith.mulf %327, %328 : vector<8x8x32xf32>
    %cst_89 = arith.constant dense<0.000000e+00> : vector<8x32xf32>
    %330 = vector.multi_reduction <add>, %329, %cst_89 [1] : vector<8x8x32xf32> to vector<8x32xf32>
    %331 = vector.shape_cast %330 : vector<8x32xf32> to vector<8x1x32xf32>
    %332 = arith.mulf %329, %329 : vector<8x8x32xf32>
    %cst_90 = arith.constant dense<0.000000e+00> : vector<8x32xf32>
    %333 = vector.multi_reduction <add>, %332, %cst_90 [1] : vector<8x8x32xf32> to vector<8x32xf32>
    %334 = vector.shape_cast %333 : vector<8x32xf32> to vector<8x1x32xf32>
    %335 = vector.broadcast %309 : f32 to vector<8x1x32xf32>
    %336 = arith.mulf %331, %335 : vector<8x1x32xf32>
    %337 = vector.broadcast %307 : f32 to vector<8x1x32xf32>
    %338 = arith.mulf %337, %336 : vector<8x1x32xf32>
    %339 = arith.mulf %338, %336 : vector<8x1x32xf32>
    %340 = arith.subf %334, %339 : vector<8x1x32xf32>
    %341 = vector.broadcast %312 : f32 to vector<8x1x32xf32>
    %342 = arith.mulf %340, %341 : vector<8x1x32xf32>
    %cst_91 = arith.constant 0.000000e+00 : f32
    %343 = vector.broadcast %cst_91 : f32 to vector<8x1x32xf32>
    %344 = arith.maximumf %342, %343 : vector<8x1x32xf32>
    %345 = vector.broadcast %336 : vector<8x1x32xf32> to vector<8x8x32xf32>
    %346 = arith.subf %327, %345 : vector<8x8x32xf32>
    %cst_92 = arith.constant 9.99999971E-10 : f32
    %347 = vector.broadcast %cst_92 : f32 to vector<8x1x32xf32>
    %348 = arith.addf %344, %347 : vector<8x1x32xf32>
    %349 = math.rsqrt %348 : vector<8x1x32xf32>
    %350 = vector.broadcast %349 : vector<8x1x32xf32> to vector<8x8x32xf32>
    %351 = arith.mulf %346, %350 : vector<8x8x32xf32>
    %352 = arith.negf %351 : vector<8x8x32xf32>
    %353 = math.exp %352 : vector<8x8x32xf32>
    %cst_93 = arith.constant 1.000000e+00 : f32
    %354 = vector.broadcast %cst_93 : f32 to vector<8x8x32xf32>
    %355 = arith.addf %354, %353 : vector<8x8x32xf32>
    %356 = arith.divf %354, %355 : vector<8x8x32xf32>
    %357 = vector.broadcast %19 : f32 to vector<8x8x32xf32>
    %358 = arith.mulf %357, %327 : vector<8x8x32xf32>
    %cst_94 = arith.constant 1.000000e+00 : f32
    %359 = vector.broadcast %cst_94 : f32 to vector<8x8x32xf32>
    %360 = arith.subf %359, %356 : vector<8x8x32xf32>
    %361 = arith.mulf %358, %360 : vector<8x8x32xf32>
    %362 = arith.mulf %327, %356 : vector<8x8x32xf32>
    %363 = arith.addf %361, %362 : vector<8x8x32xf32>
    %364 = vector.shape_cast %363 : vector<8x8x32xf32> to vector<64x32xf32>
    %c0_95 = arith.constant 0 : index
    %c0_96 = arith.constant 0 : index
    %365 = vector.load %arg6[%c0_95, %c0_96] : memref<32x16xf32, #tpu.memory_space<vmem>>, vector<32x16xf32>
    %cst_97 = arith.constant dense<0.000000e+00> : vector<64x16xf32>
    %366 = tpu.matmul %364, %365, %cst_97 {dimension_numbers = #tpu.dot_dimension_numbers<[1], [0], [0], [1], [0, 0, 1, 1], [], []>} : vector<64x32xf32>, vector<32x16xf32>, vector<64x16xf32> -> vector<64x16xf32>
    %367 = vector.shape_cast %366 : vector<64x16xf32> to vector<8x8x16xf32>
    %368 = vector.shape_cast %17 : vector<1x16xf32> to vector<1x1x16xf32>
    %369 = vector.broadcast %368 : vector<1x1x16xf32> to vector<8x8x16xf32>
    %370 = arith.addf %367, %369 : vector<8x8x16xf32>
    %371 = vector.broadcast %11 : vector<1x8x1xf32> to vector<8x8x16xf32>
    %372 = arith.mulf %370, %371 : vector<8x8x16xf32>
    %cst_98 = arith.constant dense<0.000000e+00> : vector<8x16xf32>
    %373 = vector.multi_reduction <add>, %372, %cst_98 [1] : vector<8x8x16xf32> to vector<8x16xf32>
    %374 = vector.shape_cast %373 : vector<8x16xf32> to vector<8x1x16xf32>
    %375 = arith.mulf %372, %372 : vector<8x8x16xf32>
    %cst_99 = arith.constant dense<0.000000e+00> : vector<8x16xf32>
    %376 = vector.multi_reduction <add>, %375, %cst_99 [1] : vector<8x8x16xf32> to vector<8x16xf32>
    %377 = vector.shape_cast %376 : vector<8x16xf32> to vector<8x1x16xf32>
    %378 = vector.broadcast %309 : f32 to vector<8x1x16xf32>
    %379 = arith.mulf %374, %378 : vector<8x1x16xf32>
    %380 = vector.broadcast %307 : f32 to vector<8x1x16xf32>
    %381 = arith.mulf %380, %379 : vector<8x1x16xf32>
    %382 = arith.mulf %381, %379 : vector<8x1x16xf32>
    %383 = arith.subf %377, %382 : vector<8x1x16xf32>
    %384 = vector.broadcast %312 : f32 to vector<8x1x16xf32>
    %385 = arith.mulf %383, %384 : vector<8x1x16xf32>
    %cst_100 = arith.constant 0.000000e+00 : f32
    %386 = vector.broadcast %cst_100 : f32 to vector<8x1x16xf32>
    %387 = arith.maximumf %385, %386 : vector<8x1x16xf32>
    %388 = vector.broadcast %379 : vector<8x1x16xf32> to vector<8x8x16xf32>
    %389 = arith.subf %370, %388 : vector<8x8x16xf32>
    %cst_101 = arith.constant 9.99999971E-10 : f32
    %390 = vector.broadcast %cst_101 : f32 to vector<8x1x16xf32>
    %391 = arith.addf %387, %390 : vector<8x1x16xf32>
    %392 = math.rsqrt %391 : vector<8x1x16xf32>
    %393 = vector.broadcast %392 : vector<8x1x16xf32> to vector<8x8x16xf32>
    %394 = arith.mulf %389, %393 : vector<8x8x16xf32>
    %395 = arith.negf %394 : vector<8x8x16xf32>
    %396 = math.exp %395 : vector<8x8x16xf32>
    %cst_102 = arith.constant 1.000000e+00 : f32
    %397 = vector.broadcast %cst_102 : f32 to vector<8x8x16xf32>
    %398 = arith.addf %397, %396 : vector<8x8x16xf32>
    %399 = arith.divf %397, %398 : vector<8x8x16xf32>
    %400 = vector.broadcast %20 : f32 to vector<8x8x16xf32>
    %401 = arith.mulf %400, %370 : vector<8x8x16xf32>
    %cst_103 = arith.constant 1.000000e+00 : f32
    %402 = vector.broadcast %cst_103 : f32 to vector<8x8x16xf32>
    %403 = arith.subf %402, %399 : vector<8x8x16xf32>
    %404 = arith.mulf %401, %403 : vector<8x8x16xf32>
    %405 = arith.mulf %370, %399 : vector<8x8x16xf32>
    %406 = arith.addf %404, %405 : vector<8x8x16xf32>
    %407 = vector.shape_cast %18 : vector<1x16xf32> to vector<1x1x16xf32>
    %408 = vector.broadcast %407 : vector<1x1x16xf32> to vector<8x8x16xf32>
    %409 = arith.mulf %406, %408 : vector<8x8x16xf32>
    %cst_104 = arith.constant dense<0.000000e+00> : vector<8x8xf32>
    %410 = vector.multi_reduction <add>, %409, %cst_104 [2] : vector<8x8x16xf32> to vector<8x8xf32>
    %411 = vector.shape_cast %410 : vector<8x8xf32> to vector<8x8x1xf32>
    %412 = vector.broadcast %21 : f32 to vector<8x8x1xf32>
    %413 = arith.addf %411, %412 : vector<8x8x1xf32>
    %414 = vector.broadcast %413 : vector<8x8x1xf32> to vector<8x8x32xf32>
    %415 = arith.mulf %303, %414 : vector<8x8x32xf32>
    %cst_105 = arith.constant dense<0.000000e+00> : vector<8x32xf32>
    %416 = vector.multi_reduction <add>, %415, %cst_105 [0] : vector<8x8x32xf32> to vector<8x32xf32>
    %c0_106 = arith.constant 0 : index
    %c0_107 = arith.constant 0 : index
    %417 = vector.load %arg9[%c0_106, %c0_107] : memref<8x32xf32, #tpu.memory_space<vmem>>, vector<8x32xf32>
    tpu.vector_store %arg9[%c0_106, %c0_107], %416 {strides = array<i32>} : memref<8x32xf32, #tpu.memory_space<vmem>>, vector<8x32xf32>,
    return
  }
}

</mosaic_0001>

<bundles_post_ra>
// kernel: interest_evolving_gru.1
= control target key start
LH: loop header
LB: loop body
LE: loop exit
PB: predicated region body
PF: predicated region fallthrough
CT: control target
= control target key end

     0   :  { %14 = vsyncpa [#allocation4], 0  ;;  %s5464_s0 = inlined_call_operand.vmem [shape: f32[8,32], index: 0, kind: input, shape index: {}]   ;;  %s5465_s1 = inlined_call_operand.vmem [shape: f32[8,8,32], index: 1, kind: input, shape index: {}]   ;;  %s5466_s2 = inlined_call_operand.vmem [shape: s32[1,8,1], index: 2, kind: input, shape index: {}]   ;;  %s5467_s3 = inlined_call_operand.vmem [shape: f32[32,96], index: 3, kind: input, shape index: {}]   ;;  %s5468_s4 = inlined_call_operand.vmem [shape: f32[3,32,32], index: 4, kind: input, shape index: {}]   ;;  %s5469_s5 = inlined_call_operand.vmem [shape: f32[96,32], index: 5, kind: input, shape index: {}]   ;;  %s5470_s6 = inlined_call_operand.vmem [shape: f32[32,16], index: 6, kind: input, shape index: {}]   ;;  %s5471_s7 = inlined_call_operand.vmem [shape: f32[7,32], index: 7, kind: input, shape index: {}]   ;;  %s5472_s8 = inlined_call_operand.vmem [shape: f32[3], index: 8, kind: input, shape index: {}]   ;;  %s5473_s9 = inlined_call_operand.hbm [shape: f32[8,32], index: 9, kind: output, shape index: {}]  }
   0x1   :  { %15 = vsyncpa [#allocation3], 0  ;;  %s38_s11 = sshll.u32 %s5472_s8, 4  ;;  %s39_s11 = int_to_ptr.vmem [resolvable:$true] %s38_s11 }
   0x2   :  { %s4458_s12 = scalar_lea.vmem %s39_s11, 16  ;;  %p4463_p1 = scmp.lt.s32.totalorder %s39_s11, %s39_s11 }
   0x3   :  { %p4459_p0 = scmp.ne.s32.totalorder %s39_s11, %s4458_s12  ;;  %p4464_p2 = scmp.lt.s32.totalorder %s4458_s12, %s4458_s12 }
   0x5   :  { %p4465_p3 = por %p4464_p2, %p4463_p1 }
   0x7   :  { %p4466_p4 = pnand %p4465_p3, %p4459_p0 }
   0x9   :  { %4469 = shalt.err (!%p4466_p4)
}
   0xa   :  { %s4496_s13 = smov [#allocation2]  }
   0xb   :  { %41 = dma.vmem_to_smem %s39_s11, 16, %s4496_s13, [#allocation4]  }
   0xc   :  { %4492 = dma.done.wait [#allocation4], 16  }
   0xd   :  { %4493 = vsyncadd [#allocation4], 4294967280 }
   0xe   :  { %45 = sfence }
   0xf   :  { %v90_v0 = vld [vmem:[%s5467_s3] sm:$0xff]  ;;  %v91_v1 = vld [vmem:[%s5467_s3 + $0x8] sm:$0xff]  ;;  %vm94_vm0 = vcmask 261120   ;;  %v4497_v3 = vmov 0.0|0.0   ;;  %v92_v6 = vld [vmem:[%s5467_s3 + $0x10] sm:$0xff]  ;;  %vm4498_vm1 = vmmov 0  }
  0x10   :  { %v268_v2 = vld [vmem:[%s5468_s4] sm:$0xff]  ;;  %4066 = vmatprep.subr.bf16.mxu1 %v4497_v3  ;;  %v4058_v4 = vpack.c.bf16 %v91_v1, %v90_v0  ;;  %v269_v5 = vld [vmem:[%s5468_s4 + $0x8] sm:$0xff]  ;;  %v93_v7 = vld [vmem:[%s5467_s3 + $0x18] sm:$0xff]  ;;  %v4499_v13 = vmov 0.0   ;;  %s4500_s30 = smov 64   ;;  %s4501_s3 = smov 32  }
  0x11   :  { %v4578_v8 = vpack.c.bf16 %v269_v5, %v268_v2  ;;  %v4062_v9 = vpack.c.bf16 %v93_v7, %v92_v6  ;;  %v270_v10 = vld [vmem:[%s5468_s4 + $0x10] sm:$0xff]  ;;  %v271_v11 = vld [vmem:[%s5468_s4 + $0x18] sm:$0xff]  ;;  %v47_v12 = vld [vmem:[%s5465_s1] sm:$0xff]  ;;  %3743 = vmatprep.mubr.msk.f32.mxu1 %vm4498_vm1, %v4499_v13  ;;  %s4502_s23 = smov 96   ;;  %vm2316_vm10 = vcmask 7168   ;;  %vm2476_vm11 = vcmask 523264  }
  0x12   :  { %4059 = vmatprep.subr.bf16.mxu0 %v4058_v4  ;;  %3723 = vmatprep.mubr.msk.f32.mxu0 %vm94_vm0, %v47_v12  ;;  %v4593_v14 = vpack.c.bf16 %v271_v11, %v270_v10  ;;  %v3467_v15 = vld [vmem:[%s5468_s4 + $0x20] sm:$0xff]  ;;  %v3468_v16 = vld [vmem:[%s5468_s4 + $0x28] sm:$0xff]  ;;  %v3469_v23 = vld [vmem:[%s5468_s4 + $0x30] sm:$0xff]  ;;  %s87_s16 = sld [smem:[#allocation2]]  ;;  %vm3067_vm12 = vcmask 130048   ;;  %s3454_s18 = sld [smem:[#allocation2 + $0x1]] }
  0x13   :  { %4068 = vmatpush3.bf16.msra.mxu1 %v4578_v8  ;;  %4061 = vmatpush3.bf16.msra.mxu0 %v4058_v4  ;;  %v3471_v17 = vld [vmem:[%s5468_s4 + $0x40] sm:$0xff]  ;;  %v3472_v18 = vld [vmem:[%s5468_s4 + $0x48] sm:$0xff]  ;;  %v4612_v20 = vpack.c.bf16 %v3468_v16, %v3467_v15  ;;  %v3470_v24 = vld [vmem:[%s5468_s4 + $0x38] sm:$0xff]  ;;  %vm3410_vm13 = vcmask 523520   ;;  %s4505_s20 = smov [#allocation5]  }
  0x14   :  { %4069 = vmatprep.subr.bf16.mxu1 %v4497_v3  ;;  %4063 = vmatprep.subr.bf16.mxu0 %v4062_v9  ;;  %v48_v19 = vld [vmem:[%s5465_s1 + $0x8] sm:$0xff]  ;;  %v3466_v21 = vld [vmem:[%s5471_s7 + $0x2] ss:$0 sm:$0xff]  ;;  %v3465_v22 = vld [vmem:[%s5471_s7 + $0x1] ss:$0 sm:$0xff]  ;;  %v4628_v25 = vpack.c.bf16 %v3472_v18, %v3471_v17  ;;  %v4644_v29 = vpack.c.bf16 %v3470_v24, %v3469_v23  ;;  %s3437_s21 = sshll.u32 %s4505_s20, 4  ;;  %s3438_s21 = int_to_ptr.vmem [resolvable:$true] %s3437_s21 }
  0x15   :  { %v3473_v26 = vld [vmem:[%s5468_s4 + $0x50] sm:$0xff]  ;;  %v3474_v27 = vld [vmem:[%s5468_s4 + $0x58] sm:$0xff]  ;;  %257 = vrot.lane.b32.xlu0 %v3466_v21, %s4500_s30  ;;  %241 = vrot.lane.b32.xlu1 %v3465_v22, %s4501_s3  ;;  %s4504_s4 = smov 1.0   ;;  %s4470_s22 = scalar_lea.vmem %s3438_s21, 128 }
  0x16   :  { %v49_v28 = vld [vmem:[%s5465_s1 + $0x10] sm:$0xff]  ;;  %v50_v30 = vld [vmem:[%s5465_s1 + $0x18] sm:$0xff]  ;;  %v51_v31 = vld [vmem:[%s5465_s1 + $0x20] sm:$0xff]  ;;  %v4656_v32 = vpack.c.bf16 %v3474_v27, %v3473_v26  ;;  %p4471_p5 = scmp.ne.s32.totalorder %s3438_s21, %s4470_s22  ;;  %p4475_p6 = scmp.lt.s32.totalorder %s3438_s21, %s3438_s21 }
  0x17   :  { %4071 = vmatpush3.bf16.msra.mxu1 %v4593_v14  ;;  %4065 = vmatpush3.bf16.msra.mxu0 %v4062_v9  ;;  %v52_v33 = vld [vmem:[%s5465_s1 + $0x28] sm:$0xff]  ;;  %v53_v34 = vld [vmem:[%s5465_s1 + $0x30] sm:$0xff]  ;;  %v54_v35 = vld [vmem:[%s5465_s1 + $0x38] sm:$0xff]  ;;  %p4476_p7 = scmp.lt.s32.totalorder %s4470_s22, %s4470_s22 }
  0x18   :  { %4072 = vmatprep.subr.bf16.mxu1 %v4497_v3  ;;  %4078 = vmatprep.subr.bf16.mxu0 %v4497_v3  ;;  %v3464_v36 = vld [vmem:[%s5471_s7] ss:$0 sm:$0xff]  ;;  %v4736_v63 = vld [vmem:[%s5471_s7 + $0x3] ss:$0 sm:$0xff] }
  0x19   :  { %p4477_p8 = por %p4476_p7, %p4475_p6 }
  0x1a   :  { %3724 = vmatmul.mubr.msk.f32.vlgmr.msra.gmra.mrb[0].mxu0 %vm94_vm0, %v48_v19  ;;  %3744 = vmatmul.mubr.f32.vlgmr.msra.gmra.mrb[0].mxu1 %v4499_v13 }
  0x1b   :  { %4074 = vmatpush3.bf16.msra.mxu1 %v4612_v20  ;;  %3754 = vmatprep.mubr.msk.f32.mxu1 %vm4498_vm1, %v4499_v13  ;;  %p4478_p9 = pnand %p4477_p8, %p4471_p5 }
  0x1c   :  { %4075 = vmatprep.subr.bf16.mxu1 %v4497_v3  ;;  %4080 = vmatpush3.bf16.msra.mxu0 %v4628_v25 }
  0x1d   :  { %3726 = vmatprep.mubr.msk.f32.mxu0 %vm94_vm0, %v49_v28  ;;  %4081 = vmatprep.subr.bf16.mxu0 %v4497_v3 }
  0x1e   :  { %3727 = vmatmul.mubr.msk.f32.gmra.mrb[2].mxu0 %vm94_vm0, %v50_v30 }
  0x1f   :  { %4077 = vmatpush3.bf16.msra.mxu1 %v4644_v29  ;;  %3729 = vmatprep.mubr.msk.f32.mxu0 %vm94_vm0, %v51_v31 }
  0x20   :  { %4083 = vmatpush3.bf16.msra.mxu0 %v4656_v32  ;;  %4084 = vmatprep.subr.bf16.mxu1 %v4497_v3 }
  0x21   :  { %4090 = vmatprep.subr.bf16.mxu0 %v4497_v3 }
  0x22   :  { %3755 = vmatmul.mubr.f32.vlgmr.msra.gmra.mrb[2].mxu1 %v4499_v13  ;;  %3730 = vmatmul.mubr.msk.f32.gmra.mrb[4].mxu0 %vm94_vm0, %v52_v33 }
  0x23   :  { %3732 = vmatprep.mubr.msk.f32.mxu0 %vm94_vm0, %v53_v34  ;;  %4086 = vmatpush3.bf16.msra.mxu1 %v4578_v8 }
  0x24   :  { %4087 = vmatprep.subr.bf16.mxu1 %v4497_v3  ;;  %3776 = vmatprep.mubr.msk.f32.mxu1 %vm4498_vm1, %v4499_v13 }
  0x26   :  { %3733 = vmatmul.mubr.msk.f32.gmra.mrb[6].mxu0 %vm94_vm0, %v54_v35 }
  0x27   :  { %3765 = vmatprep.mubr.msk.f32.mxu0 %vm4498_vm1, %v4499_v13  ;;  %4089 = vmatpush3.bf16.msra.mxu1 %v4593_v14 }
  0x28   :  { %4096 = vmatprep.subr.bf16.mxu1 %v4497_v3 }
  0x2a   :  { %3766 = vmatmul.mubr.f32.vlgmr.msra.gmra.mrb[8].mxu0 %v4499_v13 }
  0x2b   :  { %4092 = vmatpush3.bf16.msra.mxu0 %v4612_v20  ;;  %3787 = vmatprep.mubr.msk.f32.mxu0 %vm4498_vm1, %v4499_v13 }
  0x2c   :  { %4093 = vmatprep.subr.bf16.mxu0 %v4497_v3 }
  0x2f   :  { %4095 = vmatpush3.bf16.msra.mxu0 %v4644_v29 }
  0x30   :  { %4102 = vmatprep.subr.bf16.mxu0 %v4497_v3 }
  0x87   :  { %v4740_v4 = vpop.permute.xlu0 %257  ;;  %v4744_v10 = vpop.permute.xlu1 %241 }
  0xed   :  { %v4697_v37 = vpop.f32.mrb[0].mxu0  ;;  %v351_v38 = vpop.f32.mrb[0].mxu1 }
  0xee   :  { %v185_v39 = vpop.f32.mrb[1].mxu0  ;;  %v3745_v40 = vpop.f32.mrb[1].mxu1  ;;  %v4700_v41 = vadd.f32 %v4697_v37, %v3464_v36 }
  0xef   :  { %v228_v42 = vadd.f32 %v3464_v36, %v185_v39  ;;  %v260_v5 = vadd.f32 %v4740_v4, %v185_v39  ;;  %v244_v12 = vadd.f32 %v4744_v10, %v185_v39 }
  0xf1   :  { %v499_v43 = vadd.f32 %v351_v38, %v228_v42  ;;  %v4702_v44 = vpop.f32.mrb[2].mxu0 }
  0xf2   :  { %v4704_v45 = vpop.f32.mrb[3].mxu0  ;;  %v4707_v46 = vadd.f32 %v4702_v44, %v3464_v36 }
  0xf3   :  { %v3476_v47 = vmul.f32 -1.442695, %v499_v43  ;;  %v4710_v48 = vadd.f32 %v3464_v36, %v4704_v45 }
  0xf5   :  { %4278 = vpow2.f32 %v3476_v47  ;;  %v421_v49 = vpop.f32.mrb[2].mxu1  ;;  %v4712_v50 = vpop.f32.mrb[4].mxu0 }
  0xf6   :  { %507 = vrot.lane.b32.xlu1 %v421_v49, %s4501_s3  ;;  %v4715_v51 = vpop.f32.mrb[5].mxu0  ;;  %v3756_v52 = vpop.f32.mrb[3].mxu1  ;;  %v4718_v53 = vadd.f32 %v4712_v50, %v3464_v36 }
  0xf7   :  { %v4721_v54 = vadd.f32 %v3464_v36, %v4715_v51 }
  0xf9   :  { %v4723_v55 = vpop.f32.mrb[6].mxu0 }
  0xfa   :  { %v4725_v56 = vpop.f32.mrb[7].mxu0  ;;  %v4728_v57 = vadd.f32 %v4723_v55, %v3464_v36 }
  0xfb   :  { %v4731_v58 = vadd.f32 %v3464_v36, %v4725_v56 }
  0xfd   :  { %v495_v59 = vpop.f32.mrb[8].mxu0 }
  0xfe   :  { %v3767_v60 = vpop.f32.mrb[9].mxu0  ;;  %v496_v0 = vadd.f32 %v4736_v63, %v495_v59 }
  0xff   :  { %v4279_v61 = vpop.eup %4278 }
 0x100   :  { %v503_v62 = vadd.f32 1.0, %v4279_v61  ;;  %v245_v61 = vadd.f32 %v4697_v37, %v4744_v10 }
 0x102   :  { %4280 = vrcp.f32 %v503_v62 }
 0x10c   :  { %v4281_v1 = vpop.eup %4280 }
 0x10d   :  { %v517_v2 = vmul.f32 %v4281_v1, %v496_v0 }
 0x10f   :  { %519 = vrot.lane.b32.xlu0 %v517_v2, %s4500_s30 }
 0x168   :  { %v508_v11 = vpop.permute.xlu1 %507 }
 0x169   :  { %v510_v15 = vadd.f32 %v508_v11, %v244_v12 }
 0x16b   :  { %v3477_v16 = vmul.f32 -1.442695, %v510_v15 }
 0x181   :  { %v520_v6 = vpop.permute.xlu0 %519 }
 0x182   :  { %v522_v7 = vadd.f32 %v520_v6, %v260_v5 }
 0x184   :  { %4282 = vtanh.f32 %v522_v7 }
 0x185   :  { %4284 = vpow2.f32 %v3477_v16 }
 0x18e   :  { %v4283_v9 = vpop.eup %4282 }
 0x18f   :  { %526 = vrot.lane.b32.xlu0 %v4283_v9, %s4502_s23  ;;  %v4285_v17 = vpop.eup %4284 }
 0x190   :  { %v514_v18 = vadd.f32 1.0, %v4285_v17 }
 0x192   :  { %4286 = vrcp.f32 %v514_v18 }
 0x19c   :  { %v4287_v19 = vpop.eup %4286 }
 0x19d   :  { %v524_v21 = vsub.f32 1.0, %v4287_v19  ;;  %v530_v23 = vmul.f32 0.0, %v4287_v19 }
 0x201   :  { %v527_v22 = vpop.permute.xlu0 %526 }
 0x202   :  { %v529_v24 = vmul.f32 %v527_v22, %v524_v21 }
 0x204   :  { %v4747_v26 = vadd.f32 %v530_v23, %v529_v24 }
 0x206   :  { %533 = vrot.lane.b32.xlu1 %v4747_v26, %s4502_s23 }
 0x278   :  { %v534_v27 = vpop.permute.xlu1 %533 }
 0x279   :  { %3777 = vmatmul.mubr.msk.f32.vlgmr.msra.gmra.mrb[4].mxu1 %vm94_vm0, %v534_v27  ;;  %3788 = vmatmul.mubr.msk.f32.vlgmr.msra.gmra.mrb[10].mxu0 %vm94_vm0, %v534_v27 }
 0x27a   :  { %4098 = vmatpush3.bf16.msra.mxu1 %v4628_v25  ;;  %3798 = vmatprep.mubr.msk.f32.mxu1 %vm4498_vm1, %v4499_v13 }
 0x27b   :  { %4099 = vmatprep.subr.bf16.mxu1 %v4497_v3  ;;  %4104 = vmatpush3.bf16.msra.mxu0 %v4578_v8 }
 0x27c   :  { %4105 = vmatprep.subr.bf16.mxu0 %v4497_v3  ;;  %3809 = vmatprep.mubr.msk.f32.mxu0 %vm4498_vm1, %v4499_v13 }
 0x27e   :  { %4101 = vmatpush3.bf16.msra.mxu1 %v4656_v32 }
 0x27f   :  { %4108 = vmatprep.subr.bf16.mxu1 %v4497_v3  ;;  %4107 = vmatpush3.bf16.msra.mxu0 %v4593_v14 }
 0x280   :  { %4114 = vmatprep.subr.bf16.mxu0 %v4497_v3 }
 0x281   :  { %3799 = vmatmul.mubr.msk.f32.vlgmr.msra.gmra.mrb[6].mxu1 %vm94_vm0, %v534_v27 }
 0x282   :  { %4110 = vmatpush3.bf16.msra.mxu1 %v4612_v20  ;;  %3820 = vmatprep.mubr.msk.f32.mxu1 %vm4498_vm1, %v4499_v13 }
 0x283   :  { %4111 = vmatprep.subr.bf16.mxu1 %v4497_v3 }
 0x286   :  { %4113 = vmatpush3.bf16.msra.mxu1 %v4644_v29 }
 0x287   :  { %4120 = vmatprep.subr.bf16.mxu1 %v4497_v3 }
 0x34c   :  { %v603_v28 = vpop.f32.mrb[4].mxu1  ;;  %v673_v30 = vpop.f32.mrb[10].mxu0 }
 0x34d   :  { %v747_v31 = vadd.f32 %v603_v28, %v4700_v41  ;;  %v3778_v33 = vpop.f32.mrb[5].mxu1  ;;  %755 = vrot.lane.b32.xlu1 %v673_v30, %s4501_s3  ;;  %v3789_v34 = vpop.f32.mrb[11].mxu0  ;;  %v261_v41 = vadd.f32 %v4697_v37, %v4740_v4 }
 0x34f   :  { %v3481_v35 = vmul.f32 -1.442695, %v747_v31 }
 0x351   :  { %4288 = vpow2.f32 %v3481_v35 }
 0x354   :  { %v743_v36 = vpop.f32.mrb[6].mxu1 }
 0x355   :  { %v3800_v38 = vpop.f32.mrb[7].mxu1  ;;  %v744_v42 = vadd.f32 %v4736_v63, %v743_v36 }
 0x356   :  { %v246_v38 = vadd.f32 %v4744_v10, %v4704_v45 }
 0x35b   :  { %v4289_v39 = vpop.eup %4288 }
 0x35c   :  { %v751_v40 = vadd.f32 1.0, %v4289_v39 }
 0x35e   :  { %4290 = vrcp.f32 %v751_v40 }
 0x368   :  { %v4291_v43 = vpop.eup %4290 }
 0x369   :  { %v765_v47 = vmul.f32 %v4291_v43, %v744_v42 }
 0x36b   :  { %767 = vrot.lane.b32.xlu0 %v765_v47, %s4500_s30 }
 0x3bf   :  { %v756_v60 = vpop.permute.xlu1 %755 }
 0x3c0   :  { %v758_v62 = vadd.f32 %v756_v60, %v245_v61 }
 0x3c2   :  { %v3482_v0 = vmul.f32 -1.442695, %v758_v62 }
 0x3dd   :  { %v768_v49 = vpop.permute.xlu0 %767 }
 0x3de   :  { %v770_v52 = vadd.f32 %v768_v49, %v261_v41 }
 0x3e0   :  { %4292 = vtanh.f32 %v770_v52 }
 0x3e1   :  { %4294 = vpow2.f32 %v3482_v0 }
 0x3ea   :  { %v4293_v59 = vpop.eup %4292 }
 0x3eb   :  { %774 = vrot.lane.b32.xlu0 %v4293_v59, %s4502_s23  ;;  %v4295_v1 = vpop.eup %4294 }
 0x3ec   :  { %v762_v2 = vadd.f32 1.0, %v4295_v1 }
 0x3ee   :  { %4296 = vrcp.f32 %v762_v2 }
 0x3f8   :  { %v4297_v5 = vpop.eup %4296 }
 0x3f9   :  { %v772_v6 = vsub.f32 1.0, %v4297_v5  ;;  %v778_v11 = vmul.f32 %v4297_v5, %v4747_v26 }
 0x45d   :  { %v775_v7 = vpop.permute.xlu0 %774 }
 0x45e   :  { %v777_v9 = vmul.f32 %v775_v7, %v772_v6 }
 0x460   :  { %v4782_v12 = vadd.f32 %v778_v11, %v777_v9 }
 0x462   :  { %781 = vrot.lane.b32.xlu1 %v4782_v12, %s4502_s23 }
 0x4d4   :  { %v782_v15 = vpop.permute.xlu1 %781 }
 0x4d5   :  { %3810 = vmatmul.mubr.msk.f32.vlgmr.msra.gmra.mrb[12].mxu0 %vm94_vm0, %v782_v15  ;;  %3821 = vmatmul.mubr.msk.f32.vlgmr.msra.gmra.mrb[8].mxu1 %vm94_vm0, %v782_v15 }
 0x4d6   :  { %4116 = vmatpush3.bf16.msra.mxu0 %v4628_v25  ;;  %3831 = vmatprep.mubr.msk.f32.mxu0 %vm4498_vm1, %v4499_v13 }
 0x4d7   :  { %4117 = vmatprep.subr.bf16.mxu0 %v4497_v3  ;;  %4122 = vmatpush3.bf16.msra.mxu1 %v4578_v8 }
 0x4d8   :  { %4123 = vmatprep.subr.bf16.mxu1 %v4497_v3  ;;  %3842 = vmatprep.mubr.msk.f32.mxu1 %vm4498_vm1, %v4499_v13 }
 0x4da   :  { %4119 = vmatpush3.bf16.msra.mxu0 %v4656_v32 }
 0x4db   :  { %4126 = vmatprep.subr.bf16.mxu0 %v4497_v3  ;;  %4125 = vmatpush3.bf16.msra.mxu1 %v4593_v14 }
 0x4dc   :  { %4132 = vmatprep.subr.bf16.mxu1 %v4497_v3 }
 0x4dd   :  { %3832 = vmatmul.mubr.msk.f32.vlgmr.msra.gmra.mrb[14].mxu0 %vm94_vm0, %v782_v15 }
 0x4de   :  { %4128 = vmatpush3.bf16.msra.mxu0 %v4612_v20  ;;  %3853 = vmatprep.mubr.msk.f32.mxu0 %vm4498_vm1, %v4499_v13 }
 0x4df   :  { %4129 = vmatprep.subr.bf16.mxu0 %v4497_v3 }
 0x4e2   :  { %4131 = vmatpush3.bf16.msra.mxu0 %v4644_v29 }
 0x4e3   :  { %4138 = vmatprep.subr.bf16.mxu0 %v4497_v3 }
 0x5a8   :  { %v851_v37 = vpop.f32.mrb[12].mxu0  ;;  %v921_v16 = vpop.f32.mrb[8].mxu1 }
 0x5a9   :  { %v995_v17 = vadd.f32 %v851_v37, %v4710_v48  ;;  %1003 = vrot.lane.b32.xlu1 %v921_v16, %s4501_s3  ;;  %v3811_v18 = vpop.f32.mrb[13].mxu0  ;;  %v3822_v19 = vpop.f32.mrb[9].mxu1  ;;  %v262_v48 = vadd.f32 %v4740_v4, %v4704_v45 }
 0x5ab   :  { %v3486_v21 = vmul.f32 -1.442695, %v995_v17 }
 0x5ad   :  { %4298 = vpow2.f32 %v3486_v21 }
 0x5b0   :  { %v991_v22 = vpop.f32.mrb[14].mxu0 }
 0x5b1   :  { %v3833_v23 = vpop.f32.mrb[15].mxu0  ;;  %v992_v28 = vadd.f32 %v4736_v63, %v991_v22  ;;  %v247_v22 = vadd.f32 %v4702_v44, %v4744_v10 }
 0x5b7   :  { %v4299_v24 = vpop.eup %4298 }
 0x5b8   :  { %v999_v27 = vadd.f32 1.0, %v4299_v24 }
 0x5ba   :  { %4300 = vrcp.f32 %v999_v27 }
 0x5c4   :  { %v4301_v30 = vpop.eup %4300 }
 0x5c5   :  { %v1013_v31 = vmul.f32 %v4301_v30, %v992_v28 }
 0x5c7   :  { %1015 = vrot.lane.b32.xlu0 %v1013_v31, %s4500_s30 }
 0x61b   :  { %v1004_v36 = vpop.permute.xlu1 %1003 }
 0x61c   :  { %v1006_v39 = vadd.f32 %v1004_v36, %v246_v38 }
 0x61e   :  { %v3487_v40 = vmul.f32 -1.442695, %v1006_v39 }
 0x639   :  { %v1016_v33 = vpop.permute.xlu0 %1015 }
 0x63a   :  { %v1018_v34 = vadd.f32 %v1016_v33, %v262_v48 }
 0x63c   :  { %4302 = vtanh.f32 %v1018_v34 }
 0x63d   :  { %4304 = vpow2.f32 %v3487_v40 }
 0x646   :  { %v4303_v35 = vpop.eup %4302 }
 0x647   :  { %1022 = vrot.lane.b32.xlu0 %v4303_v35, %s4502_s23  ;;  %v4305_v42 = vpop.eup %4304 }
 0x648   :  { %v1010_v43 = vadd.f32 1.0, %v4305_v42 }
 0x64a   :  { %4306 = vrcp.f32 %v1010_v43 }
 0x654   :  { %v4307_v47 = vpop.eup %4306 }
 0x655   :  { %v1020_v41 = vsub.f32 1.0, %v4307_v47  ;;  %v1026_v52 = vmul.f32 %v4307_v47, %v4782_v12 }
 0x6b9   :  { %v1023_v49 = vpop.permute.xlu0 %1022 }
 0x6ba   :  { %v1025_v59 = vmul.f32 %v1023_v49, %v1020_v41 }
 0x6bc   :  { %v4817_v60 = vadd.f32 %v1026_v52, %v1025_v59 }
 0x6be   :  { %1029 = vrot.lane.b32.xlu1 %v4817_v60, %s4502_s23 }
 0x730   :  { %v1030_v61 = vpop.permute.xlu1 %1029 }
 0x731   :  { %3843 = vmatmul.mubr.msk.f32.vlgmr.msra.gmra.mrb[10].mxu1 %vm94_vm0, %v1030_v61  ;;  %3854 = vmatmul.mubr.msk.f32.vlgmr.msra.gmra.mrb[16].mxu0 %vm94_vm0, %v1030_v61 }
 0x732   :  { %4134 = vmatpush3.bf16.msra.mxu1 %v4628_v25  ;;  %3864 = vmatprep.mubr.msk.f32.mxu1 %vm4498_vm1, %v4499_v13 }
 0x733   :  { %4135 = vmatprep.subr.bf16.mxu1 %v4497_v3  ;;  %4140 = vmatpush3.bf16.msra.mxu0 %v4578_v8 }
 0x734   :  { %4141 = vmatprep.subr.bf16.mxu0 %v4497_v3  ;;  %3875 = vmatprep.mubr.msk.f32.mxu0 %vm4498_vm1, %v4499_v13 }
 0x736   :  { %4137 = vmatpush3.bf16.msra.mxu1 %v4656_v32 }
 0x737   :  { %4144 = vmatprep.subr.bf16.mxu1 %v4497_v3  ;;  %4143 = vmatpush3.bf16.msra.mxu0 %v4593_v14 }
 0x738   :  { %4150 = vmatprep.subr.bf16.mxu0 %v4497_v3 }
 0x739   :  { %3865 = vmatmul.mubr.msk.f32.vlgmr.msra.gmra.mrb[12].mxu1 %vm94_vm0, %v1030_v61 }
 0x73a   :  { %4146 = vmatpush3.bf16.msra.mxu1 %v4612_v20  ;;  %3886 = vmatprep.mubr.msk.f32.mxu1 %vm4498_vm1, %v4499_v13 }
 0x73b   :  { %4147 = vmatprep.subr.bf16.mxu1 %v4497_v3 }
 0x73e   :  { %4149 = vmatpush3.bf16.msra.mxu1 %v4644_v29 }
 0x73f   :  { %4156 = vmatprep.subr.bf16.mxu1 %v4497_v3 }
 0x804   :  { %v1099_v45 = vpop.f32.mrb[10].mxu1  ;;  %v1169_v62 = vpop.f32.mrb[16].mxu0 }
 0x805   :  { %v1243_v0 = vadd.f32 %v1099_v45, %v4707_v46  ;;  %v3844_v1 = vpop.f32.mrb[11].mxu1  ;;  %1251 = vrot.lane.b32.xlu1 %v1169_v62, %s4501_s3  ;;  %v3855_v2 = vpop.f32.mrb[17].mxu0  ;;  %v263_v46 = vadd.f32 %v4702_v44, %v4740_v4 }
 0x807   :  { %v3491_v5 = vmul.f32 -1.442695, %v1243_v0 }
 0x809   :  { %4308 = vpow2.f32 %v3491_v5  ;;  %v248_v5 = vadd.f32 %v4744_v10, %v4715_v51 }
 0x80c   :  { %v1239_v6 = vpop.f32.mrb[12].mxu1 }
 0x80d   :  { %v3866_v7 = vpop.f32.mrb[13].mxu1  ;;  %v1240_v15 = vadd.f32 %v4736_v63, %v1239_v6 }
 0x813   :  { %v4309_v9 = vpop.eup %4308 }
 0x814   :  { %v1247_v11 = vadd.f32 1.0, %v4309_v9 }
 0x816   :  { %4310 = vrcp.f32 %v1247_v11 }
 0x820   :  { %v4311_v37 = vpop.eup %4310 }
 0x821   :  { %v1261_v16 = vmul.f32 %v4311_v37, %v1240_v15 }
 0x823   :  { %1263 = vrot.lane.b32.xlu0 %v1261_v16, %s4500_s30 }
 0x877   :  { %v1252_v21 = vpop.permute.xlu1 %1251 }
 0x878   :  { %v1254_v23 = vadd.f32 %v1252_v21, %v247_v22 }
 0x87a   :  { %v3492_v24 = vmul.f32 -1.442695, %v1254_v23 }
 0x895   :  { %v1264_v17 = vpop.permute.xlu0 %1263 }
 0x896   :  { %v1266_v18 = vadd.f32 %v1264_v17, %v263_v46 }
 0x898   :  { %4312 = vtanh.f32 %v1266_v18 }
 0x899   :  { %4314 = vpow2.f32 %v3492_v24 }
 0x8a2   :  { %v4313_v19 = vpop.eup %4312 }
 0x8a3   :  { %1270 = vrot.lane.b32.xlu0 %v4313_v19, %s4502_s23  ;;  %v4315_v27 = vpop.eup %4314 }
 0x8a4   :  { %v1258_v28 = vadd.f32 1.0, %v4315_v27 }
 0x8a6   :  { %4316 = vrcp.f32 %v1258_v28 }
 0x8b0   :  { %v4317_v30 = vpop.eup %4316 }
 0x8b1   :  { %v1268_v31 = vsub.f32 1.0, %v4317_v30  ;;  %v1274_v34 = vmul.f32 %v4317_v30, %v4817_v60 }
 0x915   :  { %v1271_v48 = vpop.permute.xlu0 %1270 }
 0x916   :  { %v1273_v33 = vmul.f32 %v1271_v48, %v1268_v31 }
 0x918   :  { %v4852_v35 = vadd.f32 %v1274_v34, %v1273_v33 }
 0x91a   :  { %1277 = vrot.lane.b32.xlu1 %v4852_v35, %s4502_s23 }
 0x98c   :  { %v1278_v36 = vpop.permute.xlu1 %1277 }
 0x98d   :  { %3876 = vmatmul.mubr.msk.f32.vlgmr.msra.gmra.mrb[18].mxu0 %vm94_vm0, %v1278_v36  ;;  %3887 = vmatmul.mubr.msk.f32.vlgmr.msra.gmra.mrb[14].mxu1 %vm94_vm0, %v1278_v36 }
 0x98e   :  { %4152 = vmatpush3.bf16.msra.mxu0 %v4628_v25  ;;  %3897 = vmatprep.mubr.msk.f32.mxu0 %vm4498_vm1, %v4499_v13 }
 0x98f   :  { %4153 = vmatprep.subr.bf16.mxu0 %v4497_v3  ;;  %4158 = vmatpush3.bf16.msra.mxu1 %v4578_v8 }
 0x990   :  { %4159 = vmatprep.subr.bf16.mxu1 %v4497_v3  ;;  %3908 = vmatprep.mubr.msk.f32.mxu1 %vm4498_vm1, %v4499_v13 }
 0x992   :  { %4155 = vmatpush3.bf16.msra.mxu0 %v4656_v32 }
 0x993   :  { %4162 = vmatprep.subr.bf16.mxu0 %v4497_v3  ;;  %4161 = vmatpush3.bf16.msra.mxu1 %v4593_v14 }
 0x994   :  { %4168 = vmatprep.subr.bf16.mxu1 %v4497_v3 }
 0x995   :  { %3898 = vmatmul.mubr.msk.f32.vlgmr.msra.gmra.mrb[20].mxu0 %vm94_vm0, %v1278_v36 }
 0x996   :  { %4164 = vmatpush3.bf16.msra.mxu0 %v4612_v20  ;;  %3919 = vmatprep.mubr.msk.f32.mxu0 %vm4498_vm1, %v4499_v13 }
 0x997   :  { %4165 = vmatprep.subr.bf16.mxu0 %v4497_v3 }
 0x99a   :  { %4167 = vmatpush3.bf16.msra.mxu0 %v4644_v29 }
 0x99b   :  { %4174 = vmatprep.subr.bf16.mxu0 %v4497_v3 }
 0xa60   :  { %v1347_v44 = vpop.f32.mrb[18].mxu0  ;;  %v1417_v38 = vpop.f32.mrb[14].mxu1 }
 0xa61   :  { %v1491_v39 = vadd.f32 %v1347_v44, %v4721_v54  ;;  %1499 = vrot.lane.b32.xlu1 %v1417_v38, %s4501_s3  ;;  %v3877_v40 = vpop.f32.mrb[19].mxu0  ;;  %v3888_v42 = vpop.f32.mrb[15].mxu1  ;;  %v264_v54 = vadd.f32 %v4740_v4, %v4715_v51 }
 0xa62   :  { %v249_v42 = vadd.f32 %v4712_v50, %v4744_v10 }
 0xa63   :  { %v3496_v43 = vmul.f32 -1.442695, %v1491_v39 }
 0xa65   :  { %4318 = vpow2.f32 %v3496_v43 }
 0xa68   :  { %v1487_v47 = vpop.f32.mrb[20].mxu0 }
 0xa69   :  { %v3899_v41 = vpop.f32.mrb[21].mxu0  ;;  %v1488_v59 = vadd.f32 %v4736_v63, %v1487_v47 }
 0xa6f   :  { %v4319_v49 = vpop.eup %4318 }
 0xa70   :  { %v1495_v52 = vadd.f32 1.0, %v4319_v49 }
 0xa72   :  { %4320 = vrcp.f32 %v1495_v52 }
 0xa7c   :  { %v4321_v61 = vpop.eup %4320 }
 0xa7d   :  { %v1509_v45 = vmul.f32 %v4321_v61, %v1488_v59 }
 0xa7f   :  { %1511 = vrot.lane.b32.xlu0 %v1509_v45, %s4500_s30 }
 0xad3   :  { %v1500_v2 = vpop.permute.xlu1 %1499 }
 0xad4   :  { %v1502_v6 = vadd.f32 %v1500_v2, %v248_v5 }
 0xad6   :  { %v3497_v7 = vmul.f32 -1.442695, %v1502_v6 }
 0xaf1   :  { %v1512_v62 = vpop.permute.xlu0 %1511 }
 0xaf2   :  { %v1514_v0 = vadd.f32 %v1512_v62, %v264_v54 }
 0xaf4   :  { %4322 = vtanh.f32 %v1514_v0 }
 0xaf5   :  { %4324 = vpow2.f32 %v3497_v7 }
 0xafe   :  { %v4323_v1 = vpop.eup %4322 }
 0xaff   :  { %1518 = vrot.lane.b32.xlu0 %v4323_v1, %s4502_s23  ;;  %v4325_v9 = vpop.eup %4324 }
 0xb00   :  { %v1506_v11 = vadd.f32 1.0, %v4325_v9 }
 0xb02   :  { %4326 = vrcp.f32 %v1506_v11 }
 0xb0c   :  { %v4327_v15 = vpop.eup %4326 }
 0xb0d   :  { %v1516_v37 = vsub.f32 1.0, %v4327_v15  ;;  %v1522_v46 = vmul.f32 %v4327_v15, %v4852_v35 }
 0xb71   :  { %v1519_v16 = vpop.permute.xlu0 %1518 }
 0xb72   :  { %v1521_v17 = vmul.f32 %v1519_v16, %v1516_v37 }
 0xb74   :  { %v4887_v18 = vadd.f32 %v1522_v46, %v1521_v17 }
 0xb76   :  { %1525 = vrot.lane.b32.xlu1 %v4887_v18, %s4502_s23 }
 0xbe8   :  { %v1526_v19 = vpop.permute.xlu1 %1525 }
 0xbe9   :  { %3909 = vmatmul.mubr.msk.f32.vlgmr.msra.gmra.mrb[16].mxu1 %vm94_vm0, %v1526_v19  ;;  %3920 = vmatmul.mubr.msk.f32.vlgmr.msra.gmra.mrb[22].mxu0 %vm94_vm0, %v1526_v19 }
 0xbea   :  { %4170 = vmatpush3.bf16.msra.mxu1 %v4628_v25  ;;  %3930 = vmatprep.mubr.msk.f32.mxu1 %vm4498_vm1, %v4499_v13 }
 0xbeb   :  { %4171 = vmatprep.subr.bf16.mxu1 %v4497_v3  ;;  %4176 = vmatpush3.bf16.msra.mxu0 %v4578_v8 }
 0xbec   :  { %4177 = vmatprep.subr.bf16.mxu0 %v4497_v3  ;;  %3941 = vmatprep.mubr.msk.f32.mxu0 %vm4498_vm1, %v4499_v13 }
 0xbee   :  { %4173 = vmatpush3.bf16.msra.mxu1 %v4656_v32 }
 0xbef   :  { %4180 = vmatprep.subr.bf16.mxu1 %v4497_v3  ;;  %4179 = vmatpush3.bf16.msra.mxu0 %v4593_v14 }
 0xbf0   :  { %4186 = vmatprep.subr.bf16.mxu0 %v4497_v3 }
 0xbf1   :  { %3931 = vmatmul.mubr.msk.f32.vlgmr.msra.gmra.mrb[18].mxu1 %vm94_vm0, %v1526_v19  ;;  %v250_v19 = vadd.f32 %v4744_v10, %v4725_v56 }
 0xbf2   :  { %4182 = vmatpush3.bf16.msra.mxu1 %v4612_v20  ;;  %3952 = vmatprep.mubr.msk.f32.mxu1 %vm4498_vm1, %v4499_v13 }
 0xbf3   :  { %4183 = vmatprep.subr.bf16.mxu1 %v4497_v3 }
 0xbf6   :  { %4185 = vmatpush3.bf16.msra.mxu1 %v4644_v29 }
 0xbf7   :  { %4192 = vmatprep.subr.bf16.mxu1 %v4497_v3 }
 0xcbc   :  { %v1595_v51 = vpop.f32.mrb[16].mxu1  ;;  %v1665_v21 = vpop.f32.mrb[22].mxu0 }
 0xcbd   :  { %v1739_v22 = vadd.f32 %v1595_v51, %v4718_v53  ;;  %v3910_v23 = vpop.f32.mrb[17].mxu1  ;;  %1747 = vrot.lane.b32.xlu1 %v1665_v21, %s4501_s3  ;;  %v3921_v24 = vpop.f32.mrb[23].mxu0  ;;  %v265_v53 = vadd.f32 %v4712_v50, %v4740_v4 }
 0xcbf   :  { %v3501_v27 = vmul.f32 -1.442695, %v1739_v22 }
 0xcc1   :  { %4328 = vpow2.f32 %v3501_v27 }
 0xcc4   :  { %v1735_v28 = vpop.f32.mrb[18].mxu1 }
 0xcc5   :  { %v3932_v30 = vpop.f32.mrb[19].mxu1  ;;  %v1736_v33 = vadd.f32 %v4736_v63, %v1735_v28 }
 0xccb   :  { %v4329_v31 = vpop.eup %4328 }
 0xccc   :  { %v1743_v48 = vadd.f32 1.0, %v4329_v31 }
 0xcce   :  { %4330 = vrcp.f32 %v1743_v48 }
 0xcd8   :  { %v4331_v34 = vpop.eup %4330 }
 0xcd9   :  { %v1757_v36 = vmul.f32 %v4331_v34, %v1736_v33  ;;  %v55_v34 = vld [vmem:[%s5466_s2] sm:$0xff] }
 0xcda   :  { %vm58_vm2 = vcmp.gt.s32.totalorder %v55_v34, 2  ;;  %vm59_vm3 = vcmp.gt.s32.totalorder %v55_v34, 3  ;;  %vm60_vm4 = vcmp.gt.s32.totalorder %v55_v34, 4  ;;  %vm61_vm5 = vcmp.gt.s32.totalorder %v55_v34, 5 }
 0xcdb   :  { %1759 = vrot.lane.b32.xlu0 %v1757_v36, %s4500_s30  ;;  %v3449_v36 = vsel %vm59_vm3, 1.0, %v4499_v13  ;;  %vm56_vm6 = vcmp.gt.s32.totalorder %v55_v34, 0  ;;  %vm57_vm7 = vcmp.gt.s32.totalorder %v55_v34, 1  ;;  %vm62_vm8 = vcmp.gt.s32.totalorder %v55_v34, 6 }
 0xcdc   :  { %vm63_vm9 = vcmp.gt.s32.totalorder %v55_v34, 7 }
 0xd2f   :  { %v1748_v40 = vpop.permute.xlu1 %1747 }
 0xd30   :  { %v1750_v43 = vadd.f32 %v1748_v40, %v249_v42  ;;  %v3450_v42 = vsel %vm60_vm4, 1.0, %v4499_v13 }
 0xd32   :  { %v3502_v47 = vmul.f32 -1.442695, %v1750_v43  ;;  %v3451_v43 = vsel %vm61_vm5, 1.0, %v4499_v13 }
 0xd4d   :  { %v1760_v44 = vpop.permute.xlu0 %1759 }
 0xd4e   :  { %v1762_v38 = vadd.f32 %v1760_v44, %v265_v53 }
 0xd50   :  { %4332 = vtanh.f32 %v1762_v38 }
 0xd51   :  { %4334 = vpow2.f32 %v3502_v47 }
 0xd5a   :  { %v4333_v39 = vpop.eup %4332 }
 0xd5b   :  { %1766 = vrot.lane.b32.xlu0 %v4333_v39, %s4502_s23  ;;  %v4335_v41 = vpop.eup %4334 }
 0xd5c   :  { %v1754_v49 = vadd.f32 1.0, %v4335_v41  ;;  %v4268_v41 = vpack.i.bf16 %v3451_v43, %v3450_v42 }
 0xd5e   :  { %4336 = vrcp.f32 %v1754_v49 }
 0xd68   :  { %v4337_v52 = vpop.eup %4336 }
 0xd69   :  { %v1764_v59 = vsub.f32 1.0, %v4337_v52  ;;  %v1770_v54 = vmul.f32 %v4337_v52, %v4887_v18 }
 0xdcd   :  { %v1767_v61 = vpop.permute.xlu0 %1766 }
 0xdce   :  { %v1769_v45 = vmul.f32 %v1767_v61, %v1764_v59 }
 0xdd0   :  { %v4922_v62 = vadd.f32 %v1770_v54, %v1769_v45  ;;  %v4982_v54 = vsel %vm56_vm6, 1.0, %v4499_v13 }
 0xdd2   :  { %1773 = vrot.lane.b32.xlu1 %v4922_v62, %s4502_s23 }
 0xe44   :  { %v1774_v0 = vpop.permute.xlu1 %1773 }
 0xe45   :  { %3942 = vmatmul.mubr.msk.f32.vlgmr.msra.gmra.mrb[24].mxu0 %vm94_vm0, %v1774_v0  ;;  %3953 = vmatmul.mubr.msk.f32.vlgmr.msra.gmra.mrb[20].mxu1 %vm94_vm0, %v1774_v0 }
 0xe46   :  { %4188 = vmatpush3.bf16.msra.mxu0 %v4628_v25  ;;  %3963 = vmatprep.mubr.msk.f32.mxu0 %vm4498_vm1, %v4499_v13 }
 0xe47   :  { %4189 = vmatprep.subr.bf16.mxu0 %v4497_v3  ;;  %4194 = vmatpush3.bf16.msra.mxu1 %v4578_v8 }
 0xe48   :  { %4195 = vmatprep.subr.bf16.mxu1 %v4497_v3  ;;  %3974 = vmatprep.mubr.msk.f32.mxu1 %vm4498_vm1, %v4499_v13 }
 0xe4a   :  { %4191 = vmatpush3.bf16.msra.mxu0 %v4656_v32 }
 0xe4b   :  { %4198 = vmatprep.subr.bf16.mxu0 %v4497_v3  ;;  %4197 = vmatpush3.bf16.msra.mxu1 %v4593_v14 }
 0xe4c   :  { %4204 = vmatprep.subr.bf16.mxu1 %v4497_v3 }
 0xe4d   :  { %3964 = vmatmul.mubr.msk.f32.vlgmr.msra.gmra.mrb[26].mxu0 %vm94_vm0, %v1774_v0  ;;  %v3447_v0 = vsel %vm57_vm7, 1.0, %v4499_v13 }
 0xe4e   :  { %4200 = vmatpush3.bf16.msra.mxu0 %v4612_v20  ;;  %3985 = vmatprep.mubr.msk.f32.mxu0 %vm4498_vm1, %v4499_v13 }
 0xe4f   :  { %4201 = vmatprep.subr.bf16.mxu0 %v4497_v3 }
 0xe52   :  { %4203 = vmatpush3.bf16.msra.mxu0 %v4644_v29 }
 0xe53   :  { %4210 = vmatprep.subr.bf16.mxu0 %v4497_v3 }
 0xf18   :  { %v1843_v8 = vpop.f32.mrb[24].mxu0  ;;  %v1913_v50 = vpop.f32.mrb[20].mxu1 }
 0xf19   :  { %v1987_v1 = vadd.f32 %v1843_v8, %v4731_v58  ;;  %1995 = vrot.lane.b32.xlu1 %v1913_v50, %s4501_s3  ;;  %v3943_v14 = vpop.f32.mrb[25].mxu0  ;;  %v3954_v2 = vpop.f32.mrb[21].mxu1  ;;  %v266_v58 = vadd.f32 %v4740_v4, %v4725_v56  ;;  %v4503_v56 = vmov 0   ;;  %v4257_v50 = vpack.i.bf16 %v3447_v0, %v4982_v54 }
 0xf1a   :  { %4262 = vset.pattern.permute.xlu1 %v4503_v56  ;;  %4256 = vset.pattern.permute.xlu0 %v4503_v56  ;;  %v3453_v14 = vsel %vm63_vm9, 1.0, %v4499_v13 }
 0xf1b   :  { %v3506_v5 = vmul.f32 -1.442695, %v1987_v1  ;;  %v3452_v1 = vsel %vm62_vm8, 1.0, %v4499_v13 }
 0xf1c   :  { %v4273_v2 = vpack.i.bf16 %v3453_v14, %v3452_v1 }
 0xf1d   :  { %4338 = vpow2.f32 %v3506_v5  ;;  %v2468_v5 = vld [vmem:[%s5469_s5 + $0x20] sm:$0xff] }
 0xf20   :  { %v1983_v20 = vpop.f32.mrb[26].mxu0 }
 0xf21   :  { %v3965_v6 = vpop.f32.mrb[27].mxu0  ;;  %v1984_v11 = vadd.f32 %v4736_v63, %v1983_v20  ;;  %v2469_v20 = vld [vmem:[%s5469_s5 + $0x28] sm:$0xff] }
 0xf22   :  { %v4216_v6 = vpack.c.bf16 %v2469_v20, %v2468_v5 }
 0xf27   :  { %v4339_v7 = vpop.eup %4338 }
 0xf28   :  { %v1991_v9 = vadd.f32 1.0, %v4339_v7  ;;  %v2471_v7 = vld [vmem:[%s5469_s5 + $0x38] sm:$0xff] }
 0xf2a   :  { %4340 = vrcp.f32 %v1991_v9 }
 0xf34   :  { %v4341_v29 = vpop.eup %4340 }
 0xf35   :  { %v2005_v15 = vmul.f32 %v4341_v29, %v1984_v11  ;;  %v251_v11 = vadd.f32 %v4723_v55, %v4744_v10  ;;  %v2472_v10 = vld [vmem:[%s5469_s5 + $0x40] sm:$0xff] }
 0xf37   :  { %2007 = vrot.lane.b32.xlu0 %v2005_v15, %s4500_s30 }
 0xf8b   :  { %v1996_v17 = vpop.permute.xlu1 %1995 }
 0xf8c   :  { %v1998_v51 = vadd.f32 %v1996_v17, %v250_v19 }
 0xf8e   :  { %v3507_v21 = vmul.f32 -1.442695, %v1998_v51  ;;  %v2473_v51 = vld [vmem:[%s5469_s5 + $0x48] sm:$0xff] }
 0xfa9   :  { %v2008_v37 = vpop.permute.xlu0 %2007 }
 0xfaa   :  { %v2010_v16 = vadd.f32 %v2008_v37, %v266_v58  ;;  %v267_v58 = vadd.f32 %v4723_v55, %v4740_v4  ;;  %v4224_v55 = vpack.c.bf16 %v2473_v51, %v2472_v10  ;;  %v2338_v4 = vld [vmem:[%s5469_s5 + $0x10] sm:$0xff] }
 0xfac   :  { %4342 = vtanh.f32 %v2010_v16  ;;  %v2336_v16 = vld [vmem:[%s5469_s5] sm:$0xff] }
 0xfad   :  { %4344 = vpow2.f32 %v3507_v21  ;;  %v2339_v21 = vld [vmem:[%s5469_s5 + $0x18] sm:$0xff] }
 0xfb6   :  { %v4343_v46 = vpop.eup %4342 }
 0xfb7   :  { %2014 = vrot.lane.b32.xlu0 %v4343_v46, %s4502_s23  ;;  %v4345_v22 = vpop.eup %4344  ;;  %v2337_v46 = vld [vmem:[%s5469_s5 + $0x8] sm:$0xff] }
 0xfb8   :  { %v2002_v23 = vadd.f32 1.0, %v4345_v22  ;;  %v4211_v19 = vpack.c.bf16 %v2337_v46, %v2336_v16  ;;  %v2474_v22 = vld [vmem:[%s5469_s5 + $0x50] sm:$0xff] }
 0xfba   :  { %4346 = vrcp.f32 %v2002_v23  ;;  %v4214_v23 = vpack.c.bf16 %v2339_v21, %v2338_v4 }
 0xfc4   :  { %v4347_v24 = vpop.eup %4346 }
 0xfc5   :  { %v2012_v27 = vsub.f32 1.0, %v4347_v24  ;;  %v2018_v30 = vmul.f32 %v4347_v24, %v4922_v62  ;;  %v2475_v24 = vld [vmem:[%s5469_s5 + $0x58] sm:$0xff] }
0x1029   :  { %v2015_v28 = vpop.permute.xlu0 %2014 }
0x102a   :  { %v2017_v31 = vmul.f32 %v2015_v28, %v2012_v27  ;;  %v4228_v27 = vpack.c.bf16 %v2475_v24, %v2474_v22 }
0x102c   :  { %v4957_v48 = vadd.f32 %v2018_v30, %v2017_v31 }
0x102e   :  { %2021 = vrot.lane.b32.xlu1 %v4957_v48, %s4502_s23 }
0x10a0   :  { %v2022_v33 = vpop.permute.xlu1 %2021 }
0x10a1   :  { %3975 = vmatmul.mubr.msk.f32.vlgmr.msra.gmra.mrb[22].mxu1 %vm94_vm0, %v2022_v33  ;;  %3986 = vmatmul.mubr.msk.f32.vlgmr.msra.gmra.mrb[28].mxu0 %vm94_vm0, %v2022_v33 }
0x10a2   :  { %4206 = vmatpush3.bf16.msra.mxu1 %v4628_v25  ;;  %3996 = vmatprep.mubr.msk.f32.mxu1 %vm4498_vm1, %v4499_v13  ;;  %v3448_v25 = vsel %vm58_vm2, 1.0, %v4499_v13 }
0x10a3   :  { %4207 = vmatprep.subr.bf16.mxu1 %v4497_v3  ;;  %4007 = vmatprep.mubr.msk.f32.mxu0 %vm4498_vm1, %v4499_v13  ;;  %v4263_v40 = vpack.i.bf16 %v3449_v36, %v3448_v25  ;;  %v2470_v13 = vld [vmem:[%s5469_s5 + $0x30] sm:$0xff] }
0x10a4   :  { %v4220_v9 = vpack.c.bf16 %v2471_v7, %v2470_v13  ;;  %4212 = vmatpush3.bf16.msra.mxu0 %v4211_v19 }
0x10a5   :  { %4213 = vmatprep.subr.bf16.mxu0 %v4497_v3 }
0x10a6   :  { %4209 = vmatpush3.bf16.msra.mxu1 %v4656_v32 }
0x10a7   :  { %4217 = vmatprep.subr.bf16.mxu1 %v4216_v6 }
0x10a8   :  { %4215 = vmatpush3.bf16.msra.mxu0 %v4214_v23 }
0x10a9   :  { %3997 = vmatmul.mubr.msk.f32.vlgmr.msra.gmra.mrb[24].mxu1 %vm94_vm0, %v2022_v33 }
0x10aa   :  { %4219 = vmatpush3.bf16.msra.mxu1 %v4216_v6 }
0x10ab   :  { %4221 = vmatprep.subr.bf16.mxu1 %v4220_v9 }
0x10ae   :  { %4223 = vmatpush3.bf16.msra.mxu1 %v4220_v9 }
0x10af   :  { %4225 = vmatprep.subr.bf16.mxu1 %v4224_v55 }
0x10b2   :  { %4227 = vmatpush3.bf16.msra.mxu1 %v4224_v55 }
0x10b3   :  { %4229 = vmatprep.subr.bf16.mxu1 %v4228_v27 }
0x10b6   :  { %4231 = vmatpush3.bf16.msra.mxu1 %v4228_v27 }
0x1174   :  { %v2091_v53 = vpop.f32.mrb[22].mxu1  ;;  %v2161_v44 = vpop.f32.mrb[28].mxu0 }
0x1175   :  { %v2235_v32 = vadd.f32 %v2091_v53, %v4728_v57  ;;  %2243 = vrot.lane.b32.xlu1 %v2161_v44, %s4501_s3  ;;  %v3976_v38 = vpop.f32.mrb[23].mxu1  ;;  %v3987_v39 = vpop.f32.mrb[29].mxu0 }
0x1177   :  { %v3511_v47 = vmul.f32 -1.442695, %v2235_v32 }
0x1179   :  { %4348 = vpow2.f32 %v3511_v47  ;;  %4264 = vperm.xlu1 %4262, %v4263_v40  }
0x117c   :  { %v2231_v49 = vpop.f32.mrb[24].mxu1 }
0x117d   :  { %v3998_v52 = vpop.f32.mrb[25].mxu1  ;;  %4269 = vperm.xlu1 %4262, %v4268_v41   ;;  %v2232_v57 = vadd.f32 %v4736_v63, %v2231_v49  ;;  %v46_v63 = vld [vmem:[%s5464_s0] sm:$0xff] }
0x117e   :  { %4008 = vmatmul.mubr.msk.f32.vlgmr.msra.gmra.mrb[30].mxu0 %vm94_vm0, %v46_v63 }
0x1183   :  { %v4349_v59 = vpop.eup %4348 }
0x1184   :  { %v2239_v61 = vadd.f32 1.0, %v4349_v59 }
0x1186   :  { %4350 = vrcp.f32 %v2239_v61 }
0x1190   :  { %v4351_v45 = vpop.eup %4350 }
0x1191   :  { %v2253_v8 = vmul.f32 %v4351_v45, %v2232_v57 }
0x1193   :  { %2255 = vrot.lane.b32.xlu0 %v2253_v8, %s4500_s30 }
0x1197   :  { %4258 = vperm.xlu0 %4256, %v4257_v50  }
0x119b   :  { %4274 = vperm.xlu0 %4256, %v4273_v2  }
0x119f   :  { %2417 = vrot.lane.b32.xlu0 %v46_v63, %s4501_s3 }
0x11e7   :  { %v2244_v29 = vpop.permute.xlu1 %2243 }
0x11e8   :  { %v2246_v15 = vadd.f32 %v2244_v29, %v251_v11 }
0x11ea   :  { %v3512_v42 = vmul.f32 -1.442695, %v2246_v15 }
0x11f8   :  { %v4265_v30 = vpop.permute.xlu1 %4264 }
0x11f9   :  { %v4267_v3 = vunpack.i.h.bf16 %v4265_v30  ;;  %v4266_v34 = vunpack.i.l.bf16 %v4265_v30  ;;  %v2914_v30 = vld [vmem:[%s5470_s6] sm:$0xff] }
0x11fb   :  { %v5050_v44 = vmul.f32 %v4267_v3, %v4852_v35  ;;  %v5053_v32 = vmul.f32 %v4266_v34, %v4817_v60  ;;  %v2917_v34 = vld [vmem:[%s5470_s6 + $0x18] sm:$0xff] }
0x11fc   :  { %v4270_v53 = vpop.permute.xlu1 %4269 }
0x11fd   :  { %v4272_v38 = vunpack.i.h.bf16 %v4270_v53 }
0x1205   :  { %v2256_v37 = vpop.permute.xlu0 %2255 }
0x1206   :  { %v2258_v17 = vadd.f32 %v2256_v37, %v267_v58 }
0x1208   :  { %4352 = vtanh.f32 %v2258_v17 }
0x1209   :  { %4354 = vpow2.f32 %v3512_v42 }
0x1212   :  { %v4353_v28 = vpop.eup %4352 }
0x1213   :  { %2262 = vrot.lane.b32.xlu1 %v4353_v28, %s4502_s23 }
0x1216   :  { %v4259_v31 = vpop.permute.xlu0 %4258 }
0x1217   :  { %v4261_v33 = vunpack.i.h.bf16 %v4259_v31  ;;  %v5036_v56 = vunpack.i.l.bf16 %v4259_v31  ;;  %v2915_v31 = vld [vmem:[%s5470_s6 + $0x8] sm:$0xff] }
0x1218   :  { %v4232_v3 = vpack.c.bf16 %v2915_v31, %v2914_v30 }
0x1219   :  { %v5039_v25 = vmul.f32 %v4261_v33, %v4782_v12  ;;  %v5043_v36 = vmul.f32 %v5036_v56, %v4747_v26  ;;  %v4271_v12 = vunpack.i.l.bf16 %v4270_v53  ;;  %v5060_v26 = vmul.f32 %v4272_v38, %v4922_v62  ;;  %v2916_v33 = vld [vmem:[%s5470_s6 + $0x10] sm:$0xff] }
0x121a   :  { %v4275_v39 = vpop.permute.xlu0 %4274  ;;  %v2317_v62 = vsel %vm2316_vm10, %v4982_v54, 0.0  ;;  %v4236_v53 = vpack.c.bf16 %v2917_v34, %v2916_v33  ;;  %4233 = vmatprep.subr.bf16.mxu0 %v4232_v3 }
0x121b   :  { %2436 = vrot.lane.b32.xlu1 %v5043_v36, %s4502_s23  ;;  %2438 = vrot.lane.b32.xlu0 %v5039_v25, %s4502_s23  ;;  %v5063_v40 = vmul.f32 %v4271_v12, %v4887_v18  ;;  %v4276_v35 = vunpack.i.l.bf16 %v4275_v39  ;;  %v4355_v18 = vpop.eup %4354  ;;  %v4277_v61 = vunpack.i.h.bf16 %v4275_v39 }
0x121c   :  { %v2250_v43 = vadd.f32 1.0, %v4355_v18  ;;  %4235 = vmatpush3.bf16.msra.mxu0 %v4232_v3 }
0x121d   :  { %v5070_v60 = vmul.f32 %v4276_v35, %v4957_v48  ;;  %4237 = vmatprep.subr.bf16.mxu0 %v4236_v53 }
0x121e   :  { %4356 = vrcp.f32 %v2250_v43  ;;  %v2418_v45 = vpop.permute.xlu0 %2417 }
0x121f   :  { %2440 = vrot.lane.b32.xlu1 %v5053_v32, %s4502_s23  ;;  %2442 = vrot.lane.b32.xlu0 %v5050_v44, %s4502_s23  ;;  %v2420_v54 = vmul.f32 %v2418_v45, %v5043_v36  ;;  %v2421_v8 = vmul.f32 %v2418_v45, %v5039_v25  ;;  %v2422_v2 = vmul.f32 %v2418_v45, %v5053_v32 }
0x1220   :  { %v2423_v63 = vmul.f32 %v2418_v45, %v5050_v44  ;;  %v2424_v7 = vmul.f32 %v2418_v45, %v5063_v40  ;;  %v2425_v9 = vmul.f32 %v2418_v45, %v5060_v26  ;;  %v2426_v37 = vmul.f32 %v2418_v45, %v5070_v60  ;;  %4239 = vmatpush3.bf16.msra.mxu0 %v4236_v53 }
0x1223   :  { %2444 = vrot.lane.b32.xlu1 %v5063_v40, %s4502_s23  ;;  %2446 = vrot.lane.b32.xlu0 %v5060_v26, %s4502_s23 }
0x1227   :  { %2448 = vrot.lane.b32.xlu1 %v5070_v60, %s4502_s23 }
0x1228   :  { %v4357_v47 = vpop.eup %4356 }
0x1229   :  { %v2260_v41 = vsub.f32 1.0, %v4357_v47  ;;  %v2266_v52 = vmul.f32 %v4357_v47, %v4957_v48 }
0x124b   :  { %2318 = vadd.xlane.f32.xlu1 %v2317_v62  ;;  %v3514_v62 = vld [vmem:[%s5471_s7 + $0x4] ss:$0 sm:$0xff] }
0x1251   :  { %v2413_v21 = vpop.f32.mrb[30].mxu0 }
0x1252   :  { %v4009_v23 = vpop.f32.mrb[31].mxu0  ;;  %v5123_v42 = vadd.f32 %v3514_v62, %v2413_v21 }
0x1285   :  { %v2263_v49 = vpop.permute.xlu1 %2262 }
0x1286   :  { %v2265_v59 = vmul.f32 %v2263_v49, %v2260_v41 }
0x1288   :  { %v2267_v57 = vadd.f32 %v2266_v52, %v2265_v59 }
0x128a   :  { %v5076_v0 = vmul.f32 %v4277_v61, %v2267_v57 }
0x128c   :  { %2450 = vrot.lane.b32.xlu0 %v5076_v0, %s4502_s23  ;;  %v2427_v24 = vmul.f32 %v2418_v45, %v5076_v0 }
0x128d   :  { %v2437_v50 = vpop.permute.xlu1 %2436  ;;  %v2439_v1 = vpop.permute.xlu0 %2438 }
0x128e   :  { %v2460_v14 = vsel %vm94_vm0, %v2437_v50, %v2420_v54  ;;  %v2461_v48 = vsel %vm94_vm0, %v2439_v1, %v2421_v8 }
0x128f   :  { %4026 = vmatprep.mubr.msk.f32.mxu1 %vm2476_vm11, %v2460_v14 }
0x1290   :  { %4027 = vmatmul.mubr.msk.f32.vlgmr.msra.gmra.mrb[26].mxu1 %vm2476_vm11, %v2461_v48 }
0x1291   :  { %v2441_v5 = vpop.permute.xlu1 %2440  ;;  %v2443_v20 = vpop.permute.xlu0 %2442 }
0x1292   :  { %v2462_v13 = vsel %vm94_vm0, %v2441_v5, %v2422_v2  ;;  %v2463_v6 = vsel %vm94_vm0, %v2443_v20, %v2423_v63 }
0x1293   :  { %4029 = vmatprep.mubr.msk.f32.mxu1 %vm2476_vm11, %v2462_v13 }
0x1294   :  { %4030 = vmatmul.mubr.msk.f32.gmra.mrb[28].mxu1 %vm2476_vm11, %v2463_v6 }
0x1295   :  { %v2445_v11 = vpop.permute.xlu1 %2444  ;;  %v2447_v29 = vpop.permute.xlu0 %2446 }
0x1296   :  { %v2464_v15 = vsel %vm94_vm0, %v2445_v11, %v2424_v7  ;;  %v2465_v58 = vsel %vm94_vm0, %v2447_v29, %v2425_v9 }
0x1297   :  { %4032 = vmatprep.mubr.msk.f32.mxu1 %vm2476_vm11, %v2464_v15 }
0x1298   :  { %4033 = vmatmul.mubr.msk.f32.gmra.mrb[30].mxu1 %vm2476_vm11, %v2465_v58 }
0x1299   :  { %v2449_v16 = vpop.permute.xlu1 %2448 }
0x129a   :  { %v2466_v46 = vsel %vm94_vm0, %v2449_v16, %v2426_v37 }
0x129b   :  { %4035 = vmatprep.mubr.msk.f32.mxu1 %vm2476_vm11, %v2466_v46 }
0x12d8   :  { %v2319_v17 = vpop.xlane.xlu1 %2318 }
0x12d9   :  { %v2320_v19 = vrot.slane %v2319_v17, 4 }
0x12db   :  { %v2321_v10 = vadd.f32 %v2320_v19, %v2319_v17 }
0x12dd   :  { %v2322_v51 = vrot.slane %v2321_v10, 2 }
0x12df   :  { %v2323_v55 = vadd.f32 %v2322_v51, %v2321_v10 }
0x12e1   :  { %v2324_v4 = vrot.slane %v2323_v55, 1 }
0x12e3   :  { %v2325_v22 = vadd.f32 %v2324_v4, %v2323_v55 }
0x12e5   :  { %4240 = vpush %v2325_v22 }
0x12fe   :  { %v2451_v27 = vpop.permute.xlu0 %2450 }
0x12ff   :  { %v2467_v28 = vsel %vm94_vm0, %v2451_v27, %v2427_v24 }
0x1300   :  { %4036 = vmatmul.mubr.msk.f32.gmra.mrb[32].mxu1 %vm2476_vm11, %v2467_v28 }
0x1316   :  { %s5116_s11 = spop %4240 }
0x1317   :  { %s2327_s12 = smax.f32 %s4504_s4, %s5116_s11  ;;  %s3513_s0 = sadd.f32 -1.0, %s5116_s11 }
0x1318   :  { %v2328_v38 = vstv %s2327_s12 }
0x1319   :  { %4358 = vrcp.f32 %v2328_v38  ;;  %s2332_s3 = smax.f32 %s4504_s4, %s3513_s0 }
0x131a   :  { %v2333_v12 = vstv %s2332_s3 }
0x131b   :  { %4360 = vrcp.f32 %v2333_v12 }
0x1323   :  { %v4359_v39 = vpop.eup %4358 }
0x1324   :  { %4242 = vpush %v4359_v39 }
0x1325   :  { %v4361_v35 = vpop.eup %4360 }
0x1326   :  { %4244 = vpush %v4361_v35 }
0x1355   :  { %s4243_s14 = spop %4242 }
0x1356   :  { %v5153_v62 = vstv %s4243_s14 }
0x1357   :  { %s4245_s15 = spop %4244 }
0x1363   :  { %v4028_v18 = vpop.f32.mrb[26].mxu1 }
0x1364   :  { %v5126_v43 = vadd.f32 %v4028_v18, %v5123_v42  ;;  %v2567_v47 = vpop.f32.mrb[27].mxu1 }
0x1365   :  { %v5129_v41 = vadd.f32 %v2567_v47, %v5123_v42 }
0x1366   :  { %v2615_v49 = vmul.f32 %v5036_v56, %v5126_v43 }
0x1367   :  { %v2614_v52 = vmul.f32 %v5036_v56, %v5129_v41  ;;  %v4031_v59 = vpop.f32.mrb[28].mxu1 }
0x1368   :  { %v2629_v61 = vsel %vm94_vm0, %v2615_v49, 0.0  ;;  %v2679_v57 = vmul.f32 %v2615_v49, %v2615_v49  ;;  %v5137_v45 = vadd.f32 %v4031_v59, %v5123_v42  ;;  %v2577_v54 = vpop.f32.mrb[29].mxu1 }
0x1369   :  { %v2630_v8 = vrot.slane %v2629_v61, 4  ;;  %v2622_v50 = vsel %vm94_vm0, %v2614_v52, 0.0  ;;  %v2678_v1 = vmul.f32 %v2614_v52, %v2614_v52  ;;  %v5141_v14 = vadd.f32 %v2577_v54, %v5123_v42 }
0x136a   :  { %v2693_v48 = vsel %vm94_vm0, %v2679_v57, 0.0  ;;  %v2623_v2 = vrot.slane %v2622_v50, 4  ;;  %v2617_v63 = vmul.f32 %v5036_v56, %v5137_v45  ;;  %v5156_v57 = vstv %s5116_s11 }
0x136b   :  { %v2631_v5 = vadd.f32 %v2630_v8, %v2629_v61  ;;  %v2694_v20 = vrot.slane %v2693_v48, 4  ;;  %v2686_v13 = vsel %vm94_vm0, %v2678_v1, 0.0  ;;  %v2616_v6 = vmul.f32 %v5036_v56, %v5141_v14  ;;  %v4034_v7 = vpop.f32.mrb[30].mxu1 }
0x136c   :  { %v2624_v9 = vadd.f32 %v2623_v2, %v2622_v50  ;;  %v2687_v11 = vrot.slane %v2686_v13, 4  ;;  %v2643_v29 = vsel %vm94_vm0, %v2617_v63, 0.0  ;;  %v2681_v15 = vmul.f32 %v2617_v63, %v2617_v63  ;;  %v2587_v58 = vpop.f32.mrb[31].mxu1 }
0x136d   :  { %v2632_v37 = vrot.slane %v2631_v5, 2  ;;  %v2695_v16 = vadd.f32 %v2694_v20, %v2693_v48  ;;  %v2644_v46 = vrot.slane %v2643_v29, 4  ;;  %v2636_v17 = vsel %vm94_vm0, %v2616_v6, 0.0 }
0x136e   :  { %v2625_v19 = vrot.slane %v2624_v9, 2  ;;  %v2688_v10 = vadd.f32 %v2687_v11, %v2686_v13  ;;  %v2707_v51 = vsel %vm94_vm0, %v2681_v15, 0.0  ;;  %v2637_v55 = vrot.slane %v2636_v17, 4 }
0x136f   :  { %v2633_v4 = vadd.f32 %v2632_v37, %v2631_v5  ;;  %v2696_v21 = vrot.slane %v2695_v16, 2  ;;  %v2645_v22 = vadd.f32 %v2644_v46, %v2643_v29  ;;  %v2708_v23 = vrot.slane %v2707_v51, 4 }
0x1370   :  { %v2626_v24 = vadd.f32 %v2625_v19, %v2624_v9  ;;  %v2689_v27 = vrot.slane %v2688_v10, 2  ;;  %v2638_v28 = vadd.f32 %v2637_v55, %v2636_v17  ;;  %v2680_v30 = vmul.f32 %v2616_v6, %v2616_v6 }
0x1371   :  { %v2697_v31 = vadd.f32 %v2696_v21, %v2695_v16  ;;  %v2646_v33 = vrot.slane %v2645_v22, 2  ;;  %v2709_v3 = vadd.f32 %v2708_v23, %v2707_v51  ;;  %v2634_v39 = vrot.slane %v2633_v4, 1 }
0x1372   :  { %v2627_v34 = vrot.slane %v2626_v24, 1  ;;  %v2690_v53 = vadd.f32 %v2689_v27, %v2688_v10  ;;  %v2639_v38 = vrot.slane %v2638_v28, 2  ;;  %v2700_v12 = vsel %vm94_vm0, %v2680_v30, 0.0 }
0x1373   :  { %v2647_v35 = vadd.f32 %v2646_v33, %v2645_v22  ;;  %v2698_v18 = vrot.slane %v2697_v31, 1  ;;  %v2701_v52 = vrot.slane %v2700_v12, 4  ;;  %v2710_v61 = vrot.slane %v2709_v3, 2 }
0x1374   :  { %v2628_v47 = vadd.f32 %v2627_v34, %v2626_v24  ;;  %v2640_v49 = vadd.f32 %v2639_v38, %v2638_v28  ;;  %v2691_v59 = vrot.slane %v2690_v53, 1  ;;  %v5159_v50 = vadd.f32 %v4034_v7, %v5123_v42 }
0x1375   :  { %v2648_v54 = vrot.slane %v2647_v35, 1  ;;  %v2702_v8 = vadd.f32 %v2701_v52, %v2700_v12  ;;  %v2635_v1 = vadd.f32 %v2634_v39, %v2633_v4  ;;  %v5162_v48 = vadd.f32 %v2587_v58, %v5123_v42 }
0x1376   :  { %v5164_v2 = vstv %s4245_s15  ;;  %v5167_v63 = vmul.f32 %v5153_v62, %v2628_v47  ;;  %v2699_v5 = vadd.f32 %v2698_v18, %v2697_v31  ;;  %v2641_v20 = vrot.slane %v2640_v49, 1 }
0x1377   :  { %v2703_v13 = vrot.slane %v2702_v8, 2  ;;  %v2619_v6 = vmul.f32 %v5036_v56, %v5159_v50  ;;  %v2692_v9 = vadd.f32 %v2691_v59, %v2690_v53  ;;  %v2711_v11 = vadd.f32 %v2710_v61, %v2709_v3 }
0x1378   :  { %v2618_v7 = vmul.f32 %v5036_v56, %v5162_v48  ;;  %v2752_v29 = vmul.f32 %v5156_v57, %v5167_v63  ;;  %v2649_v15 = vadd.f32 %v2648_v54, %v2647_v35  ;;  %v2642_v51 = vadd.f32 %v2641_v20, %v2640_v49 }
0x1379   :  { %v2704_v58 = vadd.f32 %v2703_v13, %v2702_v8  ;;  %v2657_v37 = vsel %vm94_vm0, %v2619_v6, 0.0  ;;  %v2683_v16 = vmul.f32 %v2619_v6, %v2619_v6  ;;  %v5180_v21 = vmul.f32 %v5153_v62, %v2635_v1 }
0x137a   :  { %v2658_v46 = vrot.slane %v2657_v37, 4  ;;  %v2650_v17 = vsel %vm94_vm0, %v2618_v7, 0.0  ;;  %v2682_v19 = vmul.f32 %v2618_v7, %v2618_v7  ;;  %v2760_v10 = vmul.f32 %v2752_v29, %v5167_v63 }
0x137b   :  { %v2721_v55 = vsel %vm94_vm0, %v2683_v16, 0.0  ;;  %v2651_v4 = vrot.slane %v2650_v17, 4  ;;  %v2712_v28 = vrot.slane %v2711_v11, 1  ;;  %v2753_v33 = vmul.f32 %v5156_v57, %v5180_v21 }
0x137c   :  { %v2659_v22 = vadd.f32 %v2658_v46, %v2657_v37  ;;  %v2722_v23 = vrot.slane %v2721_v55, 4  ;;  %v2714_v24 = vsel %vm94_vm0, %v2682_v19, 0.0  ;;  %v2768_v27 = vsub.f32 %v2692_v9, %v2760_v10 }
0x137d   :  { %v2652_v30 = vadd.f32 %v2651_v4, %v2650_v17  ;;  %v2715_v31 = vrot.slane %v2714_v24, 4  ;;  %v2705_v3 = vrot.slane %v2704_v58, 1  ;;  %v2761_v35 = vmul.f32 %v2753_v33, %v5180_v21 }
0x137e   :  { %v2660_v34 = vrot.slane %v2659_v22, 2  ;;  %v2723_v53 = vadd.f32 %v2722_v23, %v2721_v55  ;;  %v2777_v38 = vmul.f32 %v5164_v2, %v2768_v27  ;;  %v5188_v18 = vmul.f32 %v5153_v62, %v2642_v51 }
0x137f   :  { %v2653_v12 = vrot.slane %v2652_v30, 2  ;;  %v2716_v39 = vadd.f32 %v2715_v31, %v2714_v24  ;;  %v5191_v59 = vmul.f32 %v5153_v62, %v2649_v15  ;;  %v2769_v8 = vsub.f32 %v2699_v5, %v2761_v35 }
0x1380   :  { %v2661_v47 = vadd.f32 %v2660_v34, %v2659_v22  ;;  %v2724_v49 = vrot.slane %v2723_v53, 2  ;;  %v2785_v52 = vmax.f32 %v2777_v38, 0.0  ;;  %v2754_v1 = vmul.f32 %v5156_v57, %v5188_v18 }
0x1381   :  { %v2654_v61 = vadd.f32 %v2653_v12, %v2652_v30  ;;  %v2717_v54 = vrot.slane %v2716_v39, 2  ;;  %v2706_v20 = vadd.f32 %v2705_v3, %v2704_v58  ;;  %v2778_v37 = vmul.f32 %v5164_v2, %v2769_v8 }
0x1382   :  { %v2662_v13 = vrot.slane %v2661_v47, 1  ;;  %v2725_v6 = vadd.f32 %v2724_v49, %v2723_v53  ;;  %v2801_v9 = vadd.f32 1e-09, %v2785_v52  ;;  %v2762_v16 = vmul.f32 %v2754_v1, %v5188_v18 }
0x1383   :  { %v2655_v7 = vrot.slane %v2654_v61, 1  ;;  %v2718_v29 = vadd.f32 %v2717_v54, %v2716_v39  ;;  %v2755_v15 = vmul.f32 %v5156_v57, %v5191_v59  ;;  %v2786_v5 = vmax.f32 %v2778_v37, 0.0 }
0x1384   :  { %v2663_v46 = vadd.f32 %v2662_v13, %v2661_v47  ;;  %4362 = vrsqrt.f32 %v2801_v9  ;;  %v2770_v19 = vsub.f32 %v2706_v20, %v2762_v16  ;;  %v2713_v10 = vadd.f32 %v2712_v28, %v2711_v11 }
0x1385   :  { %v2656_v17 = vadd.f32 %v2655_v7, %v2654_v61  ;;  %v2726_v51 = vrot.slane %v2725_v6, 1  ;;  %v2763_v58 = vmul.f32 %v2755_v15, %v5191_v59  ;;  %v2719_v4 = vrot.slane %v2718_v29, 1 }
0x1386   :  { %v2748_v55 = vmul.f32 %v5153_v62, %v2663_v46  ;;  %v2802_v22 = vadd.f32 1e-09, %v2786_v5  ;;  %v2779_v23 = vmul.f32 %v5164_v2, %v2770_v19  ;;  %v2793_v35 = vsub.f32 %v5129_v41, %v5167_v63 }
0x1387   :  { %v2747_v24 = vmul.f32 %v5153_v62, %v2656_v17  ;;  %v2771_v27 = vsub.f32 %v2713_v10, %v2763_v58  ;;  %v2727_v3 = vadd.f32 %v2726_v51, %v2725_v6  ;;  %v2720_v34 = vadd.f32 %v2719_v4, %v2718_v29 }
0x1388   :  { %v2757_v30 = vmul.f32 %v5156_v57, %v2748_v55  ;;  %4364 = vrsqrt.f32 %v2802_v22  ;;  %v2787_v31 = vmax.f32 %v2779_v23, 0.0  ;;  %v2794_v6 = vsub.f32 %v5126_v43, %v5180_v21 }
0x1389   :  { %v2756_v33 = vmul.f32 %v5156_v57, %v2747_v24  ;;  %v2780_v11 = vmul.f32 %v5164_v2, %v2771_v27  ;;  %v2795_v16 = vsub.f32 %v5141_v14, %v5188_v18  ;;  %v2796_v17 = vsub.f32 %v5137_v45, %v5191_v59 }
0x138a   :  { %v2765_v28 = vmul.f32 %v2757_v30, %v2748_v55  ;;  %v2803_v53 = vadd.f32 1e-09, %v2787_v31  ;;  %v2798_v58 = vsub.f32 %v5159_v50, %v2748_v55  ;;  %v2797_v23 = vsub.f32 %v5162_v48, %v2747_v24 }
0x138b   :  { %v2764_v38 = vmul.f32 %v2756_v33, %v2747_v24  ;;  %v2788_v12 = vmax.f32 %v2780_v11, 0.0  ;;  %v5218_v55 = vstv %s87_s16 }
0x138c   :  { %v2773_v39 = vsub.f32 %v2727_v3, %v2765_v28  ;;  %4366 = vrsqrt.f32 %v2803_v53 }
0x138d   :  { %v2772_v47 = vsub.f32 %v2720_v34, %v2764_v38  ;;  %v2804_v52 = vadd.f32 1e-09, %v2788_v12  ;;  %v2874_v38 = vmul.f32 %v5218_v55, %v5129_v41 }
0x138e   :  { %v4363_v49 = vpop.eup %4362  ;;  %v2782_v61 = vmul.f32 %v5164_v2, %v2773_v39 }
0x138f   :  { %v2817_v54 = vmul.f32 %v4363_v49, %v2793_v35  ;;  %v2781_v8 = vmul.f32 %v5164_v2, %v2772_v47  ;;  %4368 = vrsqrt.f32 %v2804_v52 }
0x1390   :  { %v2790_v1 = vmax.f32 %v2782_v61, 0.0 }
0x1391   :  { %v3524_v20 = vmul.f32 -1.442695, %v2817_v54  ;;  %v2789_v13 = vmax.f32 %v2781_v8, 0.0 }
0x1392   :  { %v2806_v9 = vadd.f32 1e-09, %v2790_v1  ;;  %v4365_v7 = vpop.eup %4364  ;;  %v2875_v1 = vmul.f32 %v5218_v55, %v5126_v43 }
0x1393   :  { %4370 = vpow2.f32 %v3524_v20  ;;  %v2805_v63 = vadd.f32 1e-09, %v2789_v13  ;;  %v2818_v29 = vmul.f32 %v4365_v7, %v2794_v6 }
0x1394   :  { %4372 = vrsqrt.f32 %v2806_v9 }
0x1395   :  { %4374 = vrsqrt.f32 %v2805_v63  ;;  %v3525_v37 = vmul.f32 -1.442695, %v2818_v29 }
0x1396   :  { %v4367_v46 = vpop.eup %4366 }
0x1397   :  { %4376 = vpow2.f32 %v3525_v37  ;;  %v2819_v15 = vmul.f32 %v4367_v46, %v2795_v16  ;;  %v2877_v46 = vmul.f32 %v5218_v55, %v5137_v45 }
0x1399   :  { %v4369_v5 = vpop.eup %4368  ;;  %v3526_v19 = vmul.f32 -1.442695, %v2819_v15 }
0x139a   :  { %v2820_v21 = vmul.f32 %v4369_v5, %v2796_v17 }
0x139b   :  { %4378 = vpow2.f32 %v3526_v19 }
0x139c   :  { %v3527_v51 = vmul.f32 -1.442695, %v2820_v21 }
0x139d   :  { %v4371_v10 = vpop.eup %4370 }
0x139e   :  { %v4373_v4 = vpop.eup %4372  ;;  %v2849_v22 = vadd.f32 1.0, %v4371_v10  ;;  %4380 = vpow2.f32 %v3527_v51  ;;  %v2879_v10 = vmul.f32 %v5218_v55, %v5159_v50 }
0x139f   :  { %v4375_v27 = vpop.eup %4374  ;;  %v2822_v18 = vmul.f32 %v4373_v4, %v2798_v58 }
0x13a0   :  { %4382 = vrcp.f32 %v2849_v22  ;;  %v2821_v30 = vmul.f32 %v4375_v27, %v2797_v23 }
0x13a1   :  { %v3529_v31 = vmul.f32 -1.442695, %v2822_v18  ;;  %v4377_v59 = vpop.eup %4376 }
0x13a2   :  { %v3528_v33 = vmul.f32 -1.442695, %v2821_v30  ;;  %v2850_v3 = vadd.f32 1.0, %v4377_v59 }
0x13a3   :  { %4384 = vpow2.f32 %v3529_v31 }
0x13a4   :  { %4386 = vpow2.f32 %v3528_v33 }
0x13a5   :  { %4388 = vrcp.f32 %v2850_v3  ;;  %v4379_v11 = vpop.eup %4378 }
0x13a6   :  { %v2851_v28 = vadd.f32 1.0, %v4379_v11 }
0x13a8   :  { %v4381_v34 = vpop.eup %4380  ;;  %4390 = vrcp.f32 %v2851_v28 }
0x13a9   :  { %v2852_v53 = vadd.f32 1.0, %v4381_v34 }
0x13aa   :  { %v4383_v24 = vpop.eup %4382 }
0x13ab   :  { %v2882_v12 = vsub.f32 1.0, %v4383_v24  ;;  %4392 = vrcp.f32 %v2852_v53  ;;  %v2898_v47 = vmul.f32 %v4383_v24, %v5129_v41  ;;  %v2876_v41 = vmul.f32 %v5218_v55, %v5141_v14 }
0x13ad   :  { %v4385_v39 = vpop.eup %4384  ;;  %v2890_v35 = vmul.f32 %v2882_v12, %v2874_v38 }
0x13ae   :  { %v4387_v49 = vpop.eup %4386  ;;  %v2854_v52 = vadd.f32 1.0, %v4385_v39 }
0x13af   :  { %v4389_v61 = vpop.eup %4388  ;;  %v2906_v54 = vadd.f32 %v2898_v47, %v2890_v35  ;;  %v2853_v8 = vadd.f32 1.0, %v4387_v49 }
0x13b0   :  { %v2883_v20 = vsub.f32 1.0, %v4389_v61  ;;  %4394 = vrcp.f32 %v2854_v52  ;;  %v2899_v6 = vmul.f32 %v4389_v61, %v5126_v43 }
0x13b1   :  { %4046 = vmatprep.mubr.msk.f32.mxu0 %vm94_vm0, %v2906_v54  ;;  %4396 = vrcp.f32 %v2853_v8 }
0x13b2   :  { %v2891_v13 = vmul.f32 %v2883_v20, %v2875_v1  ;;  %v4391_v9 = vpop.eup %4390 }
0x13b3   :  { %v2884_v63 = vsub.f32 1.0, %v4391_v9  ;;  %v2900_v16 = vmul.f32 %v4391_v9, %v5141_v14  ;;  %v2878_v14 = vmul.f32 %v5218_v55, %v5162_v48 }
0x13b4   :  { %v2907_v7 = vadd.f32 %v2899_v6, %v2891_v13 }
0x13b5   :  { %v4393_v29 = vpop.eup %4392  ;;  %v2892_v37 = vmul.f32 %v2884_v63, %v2876_v41 }
0x13b6   :  { %4047 = vmatmul.mubr.msk.f32.vlgmr.msra.gmra.mrb[32].mxu0 %vm94_vm0, %v2907_v7  ;;  %v2885_v15 = vsub.f32 1.0, %v4393_v29  ;;  %v2901_v43 = vmul.f32 %v4393_v29, %v5137_v45 }
0x13b7   :  { %v2908_v17 = vadd.f32 %v2900_v16, %v2892_v37 }
0x13b8   :  { %v2893_v5 = vmul.f32 %v2885_v15, %v2877_v46 }
0x13b9   :  { %4049 = vmatprep.mubr.msk.f32.mxu0 %vm94_vm0, %v2908_v17 }
0x13ba   :  { %v4395_v19 = vpop.eup %4394  ;;  %v2909_v51 = vadd.f32 %v2901_v43, %v2893_v5 }
0x13bb   :  { %v4397_v21 = vpop.eup %4396  ;;  %v2887_v58 = vsub.f32 1.0, %v4395_v19  ;;  %v2903_v45 = vmul.f32 %v4395_v19, %v5159_v50 }
0x13bc   :  { %v2886_v4 = vsub.f32 1.0, %v4397_v21  ;;  %4050 = vmatmul.mubr.msk.f32.gmra.mrb[34].mxu0 %vm94_vm0, %v2909_v51  ;;  %v2902_v27 = vmul.f32 %v4397_v21, %v5162_v48 }
0x13bd   :  { %v2895_v22 = vmul.f32 %v2887_v58, %v2879_v10 }
0x13be   :  { %v2894_v23 = vmul.f32 %v2886_v4, %v2878_v14 }
0x13bf   :  { %v2911_v30 = vadd.f32 %v2903_v45, %v2895_v22 }
0x13c0   :  { %v2910_v18 = vadd.f32 %v2902_v27, %v2894_v23 }
0x13c2   :  { %4052 = vmatprep.mubr.msk.f32.mxu0 %vm94_vm0, %v2910_v18 }
0x13c3   :  { %4053 = vmatmul.mubr.msk.f32.gmra.mrb[36].mxu0 %vm94_vm0, %v2911_v30 }
0x13d3   :  { %v4037_v31 = vpop.f32.mrb[32].mxu1 }
0x13d4   :  { %v5245_v59 = vadd.f32 %v4037_v31, %v5123_v42  ;;  %v2597_v33 = vpop.f32.mrb[33].mxu1 }
0x13d5   :  { %v5248_v3 = vadd.f32 %v2597_v33, %v5123_v42 }
0x13d6   :  { %v2621_v11 = vmul.f32 %v5036_v56, %v5245_v59 }
0x13d7   :  { %v2620_v50 = vmul.f32 %v5036_v56, %v5248_v3 }
0x13d8   :  { %v2671_v48 = vsel %vm94_vm0, %v2621_v11, 0.0  ;;  %v2685_v28 = vmul.f32 %v2621_v11, %v2621_v11 }
0x13d9   :  { %v2672_v34 = vrot.slane %v2671_v48, 4  ;;  %v2664_v24 = vsel %vm94_vm0, %v2620_v50, 0.0  ;;  %v2684_v53 = vmul.f32 %v2620_v50, %v2620_v50 }
0x13da   :  { %v2735_v38 = vsel %vm94_vm0, %v2685_v28, 0.0  ;;  %v2665_v12 = vrot.slane %v2664_v24, 4 }
0x13db   :  { %v2673_v39 = vadd.f32 %v2672_v34, %v2671_v48  ;;  %v2736_v35 = vrot.slane %v2735_v38, 4  ;;  %v2728_v42 = vsel %vm94_vm0, %v2684_v53, 0.0 }
0x13dc   :  { %v2666_v47 = vadd.f32 %v2665_v12, %v2664_v24  ;;  %v2729_v49 = vrot.slane %v2728_v42, 4 }
0x13dd   :  { %v2674_v52 = vrot.slane %v2673_v39, 2  ;;  %v2737_v61 = vadd.f32 %v2736_v35, %v2735_v38 }
0x13de   :  { %v2667_v54 = vrot.slane %v2666_v47, 2  ;;  %v2730_v8 = vadd.f32 %v2729_v49, %v2728_v42  ;;  %v2881_v42 = vmul.f32 %v5218_v55, %v5245_v59  ;;  %v2880_v49 = vmul.f32 %v5218_v55, %v5248_v3 }
0x13df   :  { %v2675_v1 = vadd.f32 %v2674_v52, %v2673_v39  ;;  %v2738_v20 = vrot.slane %v2737_v61, 2 }
0x13e0   :  { %v2668_v13 = vadd.f32 %v2667_v54, %v2666_v47  ;;  %v2731_v6 = vrot.slane %v2730_v8, 2 }
0x13e1   :  { %v2676_v9 = vrot.slane %v2675_v1, 1  ;;  %v2739_v41 = vadd.f32 %v2738_v20, %v2737_v61 }
0x13e2   :  { %v2669_v7 = vrot.slane %v2668_v13, 1  ;;  %v2732_v63 = vadd.f32 %v2731_v6, %v2730_v8  ;;  %v5277_v6 = vld [vmem:[%s5471_s7 + $0x5] ss:$0 sm:$0xff] }
0x13e3   :  { %v2677_v29 = vadd.f32 %v2676_v9, %v2675_v1  ;;  %v2740_v16 = vrot.slane %v2739_v41, 1 }
0x13e4   :  { %v2670_v37 = vadd.f32 %v2669_v7, %v2668_v13  ;;  %v2733_v15 = vrot.slane %v2732_v63, 1 }
0x13e5   :  { %v2750_v46 = vmul.f32 %v5153_v62, %v2677_v29  ;;  %v2741_v19 = vadd.f32 %v2740_v16, %v2739_v41 }
0x13e6   :  { %v2749_v17 = vmul.f32 %v5153_v62, %v2670_v37  ;;  %v2734_v10 = vadd.f32 %v2733_v15, %v2732_v63 }
0x13e7   :  { %v2759_v5 = vmul.f32 %v5156_v57, %v2750_v46  ;;  %v2800_v30 = vsub.f32 %v5245_v59, %v2750_v46 }
0x13e8   :  { %v2758_v43 = vmul.f32 %v5156_v57, %v2749_v17  ;;  %v2799_v33 = vsub.f32 %v5248_v3, %v2749_v17 }
0x13e9   :  { %v2767_v21 = vmul.f32 %v2759_v5, %v2750_v46 }
0x13ea   :  { %v2766_v51 = vmul.f32 %v2758_v43, %v2749_v17 }
0x13eb   :  { %v2775_v58 = vsub.f32 %v2741_v19, %v2767_v21 }
0x13ec   :  { %v2774_v14 = vsub.f32 %v2734_v10, %v2766_v51 }
0x13ed   :  { %v2784_v4 = vmul.f32 %v5164_v2, %v2775_v58 }
0x13ee   :  { %v2783_v22 = vmul.f32 %v5164_v2, %v2774_v14 }
0x13ef   :  { %v2792_v23 = vmax.f32 %v2784_v4, 0.0 }
0x13f0   :  { %v2791_v27 = vmax.f32 %v2783_v22, 0.0 }
0x13f1   :  { %v2808_v45 = vadd.f32 1e-09, %v2792_v23 }
0x13f2   :  { %v2807_v18 = vadd.f32 1e-09, %v2791_v27 }
0x13f3   :  { %4398 = vrsqrt.f32 %v2808_v45 }
0x13f4   :  { %4400 = vrsqrt.f32 %v2807_v18 }
0x13fd   :  { %v4399_v31 = vpop.eup %4398 }
0x13fe   :  { %v4401_v11 = vpop.eup %4400  ;;  %v2824_v50 = vmul.f32 %v4399_v31, %v2800_v30 }
0x13ff   :  { %v2823_v48 = vmul.f32 %v4401_v11, %v2799_v33 }
0x1400   :  { %v3531_v28 = vmul.f32 -1.442695, %v2824_v50 }
0x1401   :  { %v3530_v34 = vmul.f32 -1.442695, %v2823_v48 }
0x1402   :  { %4402 = vpow2.f32 %v3531_v28 }
0x1403   :  { %4404 = vpow2.f32 %v3530_v34 }
0x140c   :  { %v4403_v24 = vpop.eup %4402 }
0x140d   :  { %v4405_v53 = vpop.eup %4404  ;;  %v2856_v38 = vadd.f32 1.0, %v4403_v24 }
0x140e   :  { %v2855_v12 = vadd.f32 1.0, %v4405_v53 }
0x140f   :  { %4406 = vrcp.f32 %v2856_v38 }
0x1410   :  { %4408 = vrcp.f32 %v2855_v12 }
0x1419   :  { %v4407_v39 = vpop.eup %4406 }
0x141a   :  { %v4409_v35 = vpop.eup %4408  ;;  %v2889_v47 = vsub.f32 1.0, %v4407_v39  ;;  %v2905_v1 = vmul.f32 %v4407_v39, %v5245_v59 }
0x141b   :  { %v2888_v52 = vsub.f32 1.0, %v4409_v35  ;;  %v2904_v54 = vmul.f32 %v4409_v35, %v5248_v3 }
0x141c   :  { %v2897_v61 = vmul.f32 %v2889_v47, %v2881_v42 }
0x141d   :  { %v2896_v8 = vmul.f32 %v2888_v52, %v2880_v49 }
0x141e   :  { %v2913_v13 = vadd.f32 %v2905_v1, %v2897_v61 }
0x141f   :  { %v2912_v20 = vadd.f32 %v2904_v54, %v2896_v8 }
0x1421   :  { %4055 = vmatprep.mubr.msk.f32.mxu0 %vm94_vm0, %v2912_v20 }
0x1422   :  { %4056 = vmatmul.mubr.msk.f32.gmra.mrb[38].mxu0 %vm94_vm0, %v2913_v13 }
0x1489   :  { %v4048_v9 = vpop.f32.mrb[32].mxu0 }
0x148a   :  { %v5280_v55 = vadd.f32 %v4048_v9, %v5277_v6  ;;  %v3008_v41 = vpop.f32.mrb[33].mxu0 }
0x148b   :  { %v5283_v3 = vadd.f32 %v5277_v6, %v3008_v41 }
0x148c   :  { %v3060_v59 = vmul.f32 %v5036_v56, %v5280_v55 }
0x148d   :  { %v3059_v7 = vmul.f32 %v5036_v56, %v5283_v3 }
0x148e   :  { %v3075_v63 = vsel %vm3067_vm12, %v3060_v59, 0.0  ;;  %v3125_v29 = vmul.f32 %v3060_v59, %v3060_v59 }
0x148f   :  { %v3076_v37 = vrot.slane %v3075_v63, 4  ;;  %v3068_v16 = vsel %vm3067_vm12, %v3059_v7, 0.0  ;;  %v3124_v46 = vmul.f32 %v3059_v7, %v3059_v7  ;;  %v4051_v5 = vpop.f32.mrb[34].mxu0 }
0x1490   :  { %v3139_v15 = vsel %vm3067_vm12, %v3125_v29, 0.0  ;;  %v3069_v17 = vrot.slane %v3068_v16, 4  ;;  %v5294_v10 = vadd.f32 %v4051_v5, %v5277_v6  ;;  %v3018_v51 = vpop.f32.mrb[35].mxu0 }
0x1491   :  { %v3077_v43 = vadd.f32 %v3076_v37, %v3075_v63  ;;  %v3140_v19 = vrot.slane %v3139_v15, 4  ;;  %v3132_v21 = vsel %vm3067_vm12, %v3124_v46, 0.0  ;;  %v5297_v4 = vadd.f32 %v5277_v6, %v3018_v51 }
0x1492   :  { %v3070_v58 = vadd.f32 %v3069_v17, %v3068_v16  ;;  %v3133_v14 = vrot.slane %v3132_v21, 4  ;;  %v3062_v27 = vmul.f32 %v5036_v56, %v5294_v10 }
0x1493   :  { %v3078_v22 = vrot.slane %v3077_v43, 2  ;;  %v3141_v23 = vadd.f32 %v3140_v19, %v3139_v15  ;;  %v3061_v30 = vmul.f32 %v5036_v56, %v5297_v4 }
0x1494   :  { %v3071_v45 = vrot.slane %v3070_v58, 2  ;;  %v3134_v18 = vadd.f32 %v3133_v14, %v3132_v21  ;;  %v3089_v11 = vsel %vm3067_vm12, %v3062_v27, 0.0  ;;  %v3127_v50 = vmul.f32 %v3062_v27, %v3062_v27 }
0x1495   :  { %v3079_v31 = vadd.f32 %v3078_v22, %v3077_v43  ;;  %v3142_v33 = vrot.slane %v3141_v23, 2  ;;  %v3090_v34 = vrot.slane %v3089_v11, 4  ;;  %v3082_v24 = vsel %vm3067_vm12, %v3061_v30, 0.0 }
0x1496   :  { %v3072_v48 = vadd.f32 %v3071_v45, %v3070_v58  ;;  %v3135_v28 = vrot.slane %v3134_v18, 2  ;;  %v4054_v53 = vpop.f32.mrb[36].mxu0  ;;  %v3153_v39 = vsel %vm3067_vm12, %v3127_v50, 0.0  ;;  %v3083_v35 = vrot.slane %v3082_v24, 4 }
0x1497   :  { %v3080_v38 = vrot.slane %v3079_v31, 1  ;;  %v3143_v12 = vadd.f32 %v3142_v33, %v3141_v23  ;;  %v3028_v42 = vpop.f32.mrb[37].mxu0  ;;  %v3091_v52 = vadd.f32 %v3090_v34, %v3089_v11  ;;  %v3154_v61 = vrot.slane %v3153_v39, 4 }
0x1498   :  { %v3073_v47 = vrot.slane %v3072_v48, 1  ;;  %v3136_v49 = vadd.f32 %v3135_v28, %v3134_v18  ;;  %v3084_v1 = vadd.f32 %v3083_v35, %v3082_v24  ;;  %v3126_v20 = vmul.f32 %v3061_v30, %v3061_v30 }
0x1499   :  { %v3081_v54 = vadd.f32 %v3080_v38, %v3079_v31  ;;  %v3144_v8 = vrot.slane %v3143_v12, 1  ;;  %v3092_v41 = vrot.slane %v3091_v52, 2  ;;  %v3155_v59 = vadd.f32 %v3154_v61, %v3153_v39 }
0x149a   :  { %v3074_v13 = vadd.f32 %v3073_v47, %v3072_v48  ;;  %v3137_v9 = vrot.slane %v3136_v49, 1  ;;  %v3085_v63 = vrot.slane %v3084_v1, 2  ;;  %v3146_v29 = vsel %vm3067_vm12, %v3126_v20, 0.0 }
0x149b   :  { %v5307_v7 = vmul.f32 %v3081_v54, %v5153_v62  ;;  %v3093_v16 = vadd.f32 %v3092_v41, %v3091_v52  ;;  %v3156_v46 = vrot.slane %v3155_v59, 2  ;;  %v3145_v15 = vadd.f32 %v3144_v8, %v3143_v12 }
0x149c   :  { %v5311_v37 = vmul.f32 %v3074_v13, %v5153_v62  ;;  %v3086_v5 = vadd.f32 %v3085_v63, %v3084_v1  ;;  %v3147_v43 = vrot.slane %v3146_v29, 4  ;;  %v3138_v19 = vadd.f32 %v3137_v9, %v3136_v49 }
0x149d   :  { %v3197_v17 = vmul.f32 %v5307_v7, %v5156_v57  ;;  %v3094_v51 = vrot.slane %v3093_v16, 1  ;;  %v3157_v58 = vadd.f32 %v3156_v46, %v3155_v59  ;;  %v5319_v27 = vadd.f32 %v4054_v53, %v5277_v6 }
0x149e   :  { %v3196_v21 = vmul.f32 %v5311_v37, %v5156_v57  ;;  %v3087_v22 = vrot.slane %v3086_v5, 1  ;;  %v3148_v23 = vadd.f32 %v3147_v43, %v3146_v29  ;;  %v5323_v31 = vadd.f32 %v5277_v6, %v3028_v42 }
0x149f   :  { %v3205_v14 = vmul.f32 %v3197_v17, %v5307_v7  ;;  %v3095_v18 = vadd.f32 %v3094_v51, %v3093_v16  ;;  %v3158_v30 = vrot.slane %v3157_v58, 1  ;;  %v3064_v48 = vmul.f32 %v5036_v56, %v5319_v27 }
0x14a0   :  { %v3204_v45 = vmul.f32 %v3196_v21, %v5311_v37  ;;  %v3088_v11 = vadd.f32 %v3087_v22, %v3086_v5  ;;  %v3149_v50 = vrot.slane %v3148_v23, 2  ;;  %v3063_v24 = vmul.f32 %v5036_v56, %v5323_v31 }
0x14a1   :  { %v3213_v33 = vsub.f32 %v3145_v15, %v3205_v14  ;;  %v5328_v34 = vmul.f32 %v3095_v18, %v5153_v62  ;;  %v3103_v39 = vsel %vm3067_vm12, %v3064_v48, 0.0  ;;  %v3159_v52 = vadd.f32 %v3158_v30, %v3157_v58 }
0x14a2   :  { %v3212_v28 = vsub.f32 %v3138_v19, %v3204_v45  ;;  %v3150_v38 = vadd.f32 %v3149_v50, %v3148_v23  ;;  %v5334_v12 = vmul.f32 %v3088_v11, %v5153_v62  ;;  %v3104_v47 = vrot.slane %v3103_v39, 4 }
0x14a3   :  { %v3221_v53 = vmul.f32 %v3213_v33, %v5164_v2  ;;  %v3199_v42 = vmul.f32 %v5328_v34, %v5156_v57  ;;  %v3129_v13 = vmul.f32 %v3064_v48, %v3064_v48  ;;  %v3096_v63 = vsel %vm3067_vm12, %v3063_v24, 0.0 }
0x14a4   :  { %v3220_v35 = vmul.f32 %v3212_v28, %v5164_v2  ;;  %v3151_v61 = vrot.slane %v3150_v38, 1  ;;  %v3198_v54 = vmul.f32 %v5334_v12, %v5156_v57  ;;  %v3105_v20 = vadd.f32 %v3104_v47, %v3103_v39 }
0x14a5   :  { %v3229_v49 = vmax.f32 %v3221_v53, 0.0  ;;  %v3207_v1 = vmul.f32 %v3199_v42, %v5328_v34  ;;  %v3167_v15 = vsel %vm3067_vm12, %v3129_v13, 0.0  ;;  %v3097_v43 = vrot.slane %v3096_v63, 4 }
0x14a6   :  { %v3228_v8 = vmax.f32 %v3220_v35, 0.0  ;;  %v3152_v41 = vadd.f32 %v3151_v61, %v3150_v38  ;;  %v3206_v59 = vmul.f32 %v3198_v54, %v5334_v12  ;;  %v3106_v46 = vrot.slane %v3105_v20, 2 }
0x14a7   :  { %v3245_v9 = vadd.f32 1e-09, %v3229_v49  ;;  %v3215_v16 = vsub.f32 %v3159_v52, %v3207_v1  ;;  %v3168_v5 = vrot.slane %v3167_v15, 4  ;;  %v3128_v51 = vmul.f32 %v3063_v24, %v3063_v24 }
0x14a8   :  { %v3244_v29 = vadd.f32 1e-09, %v3228_v8  ;;  %v3214_v17 = vsub.f32 %v3152_v41, %v3206_v59  ;;  %v3107_v21 = vadd.f32 %v3106_v46, %v3105_v20  ;;  %v3098_v22 = vadd.f32 %v3097_v43, %v3096_v63 }
0x14a9   :  { %4410 = vrsqrt.f32 %v3245_v9  ;;  %v3223_v19 = vmul.f32 %v3215_v16, %v5164_v2  ;;  %v3169_v14 = vadd.f32 %v3168_v5, %v3167_v15  ;;  %v3160_v18 = vsel %vm3067_vm12, %v3128_v51, 0.0 }
0x14aa   :  { %4412 = vrsqrt.f32 %v3244_v29  ;;  %v3222_v58 = vmul.f32 %v3214_v17, %v5164_v2  ;;  %v3108_v45 = vrot.slane %v3107_v21, 1  ;;  %v3099_v11 = vrot.slane %v3098_v22, 2 }
0x14ab   :  { %v3231_v23 = vmax.f32 %v3223_v19, 0.0  ;;  %v3170_v33 = vrot.slane %v3169_v14, 2  ;;  %v3161_v50 = vrot.slane %v3160_v18, 4  ;;  %v3237_v52 = vsub.f32 %v5280_v55, %v5307_v7 }
0x14ac   :  { %v3230_v30 = vmax.f32 %v3222_v58, 0.0  ;;  %v3109_v28 = vadd.f32 %v3108_v45, %v3107_v21  ;;  %v3100_v39 = vadd.f32 %v3099_v11, %v3098_v22  ;;  %v3236_v8 = vsub.f32 %v5283_v3, %v5311_v37 }
0x14ad   :  { %v3247_v48 = vadd.f32 1e-09, %v3231_v23  ;;  %v3171_v38 = vadd.f32 %v3170_v33, %v3169_v14  ;;  %v3162_v35 = vadd.f32 %v3161_v50, %v3160_v18  ;;  %v3239_v37 = vsub.f32 %v5294_v10, %v5328_v34 }
0x14ae   :  { %v3246_v53 = vadd.f32 1e-09, %v3230_v30  ;;  %v3193_v24 = vmul.f32 %v3109_v28, %v5153_v62  ;;  %v3101_v47 = vrot.slane %v3100_v39, 1  ;;  %v3238_v51 = vsub.f32 %v5297_v4, %v5334_v12 }
0x14af   :  { %4414 = vrsqrt.f32 %v3247_v48  ;;  %v3172_v42 = vrot.slane %v3171_v38, 1  ;;  %v3163_v49 = vrot.slane %v3162_v35, 2 }
0x14b0   :  { %4416 = vrsqrt.f32 %v3246_v53  ;;  %v3201_v61 = vmul.f32 %v3193_v24, %v5156_v57  ;;  %v3102_v1 = vadd.f32 %v3101_v47, %v3100_v39 }
0x14b1   :  { %v3164_v20 = vadd.f32 %v3163_v49, %v3162_v35  ;;  %v3173_v41 = vadd.f32 %v3172_v42, %v3171_v38  ;;  %v3241_v38 = vsub.f32 %v5319_v27, %v3193_v24 }
0x14b2   :  { %v3209_v59 = vmul.f32 %v3201_v61, %v3193_v24  ;;  %v3192_v16 = vmul.f32 %v3102_v1, %v5153_v62  ;;  %v5365_v1 = vstv %s3454_s18 }
0x14b3   :  { %v4411_v54 = vpop.eup %4410  ;;  %v3165_v29 = vrot.slane %v3164_v20, 1  ;;  %v3318_v24 = vmul.f32 %v5365_v1, %v5280_v55 }
0x14b4   :  { %v4413_v13 = vpop.eup %4412  ;;  %v3261_v9 = vmul.f32 %v4411_v54, %v3237_v52  ;;  %v3217_v15 = vsub.f32 %v3173_v41, %v3209_v59  ;;  %v3200_v7 = vmul.f32 %v3192_v16, %v5156_v57  ;;  %v3240_v54 = vsub.f32 %v5323_v31, %v3192_v16 }
0x14b5   :  { %v3260_v63 = vmul.f32 %v4413_v13, %v3236_v8  ;;  %v3166_v43 = vadd.f32 %v3165_v29, %v3164_v20 }
0x14b6   :  { %v3542_v46 = vmul.f32 -1.442695, %v3261_v9  ;;  %v3225_v5 = vmul.f32 %v3217_v15, %v5164_v2  ;;  %v3208_v19 = vmul.f32 %v3200_v7, %v3192_v16  ;;  %v5375_v15 = vld [vmem:[%s5471_s7 + $0x6] ss:$0 sm:$0xff]  ;;  %s3455_s7 = sld [smem:[#allocation2 + $0x2]] }
0x14b7   :  { %v3541_v17 = vmul.f32 -1.442695, %v3260_v63  ;;  %v3317_v63 = vmul.f32 %v5365_v1, %v5283_v3 }
0x14b8   :  { %4418 = vpow2.f32 %v3542_v46  ;;  %v3233_v58 = vmax.f32 %v3225_v5, 0.0  ;;  %v3216_v23 = vsub.f32 %v3166_v43, %v3208_v19 }
0x14b9   :  { %4420 = vpow2.f32 %v3541_v17  ;;  %v4415_v21 = vpop.eup %4414 }
0x14ba   :  { %v4417_v14 = vpop.eup %4416  ;;  %v3263_v22 = vmul.f32 %v4415_v21, %v3239_v37  ;;  %v3249_v18 = vadd.f32 1e-09, %v3233_v58  ;;  %v3224_v33 = vmul.f32 %v3216_v23, %v5164_v2  ;;  %v3319_v23 = vmul.f32 %v5365_v1, %v5297_v4 }
0x14bb   :  { %v3262_v45 = vmul.f32 %v4417_v14, %v3238_v51  ;;  %v3320_v51 = vmul.f32 %v5365_v1, %v5294_v10 }
0x14bc   :  { %v3544_v30 = vmul.f32 -1.442695, %v3263_v22  ;;  %4422 = vrsqrt.f32 %v3249_v18  ;;  %v3232_v50 = vmax.f32 %v3224_v33, 0.0 }
0x14bd   :  { %v3543_v11 = vmul.f32 -1.442695, %v3262_v45 }
0x14be   :  { %4424 = vpow2.f32 %v3544_v30  ;;  %v3248_v34 = vadd.f32 1e-09, %v3232_v50 }
0x14bf   :  { %4426 = vpow2.f32 %v3543_v11 }
0x14c0   :  { %4428 = vrsqrt.f32 %v3248_v34 }
0x14c2   :  { %v4419_v48 = vpop.eup %4418 }
0x14c3   :  { %v4421_v28 = vpop.eup %4420  ;;  %v3293_v53 = vadd.f32 1.0, %v4419_v48 }
0x14c4   :  { %v3292_v12 = vadd.f32 1.0, %v4421_v28 }
0x14c5   :  { %4430 = vrcp.f32 %v3293_v53 }
0x14c6   :  { %4432 = vrcp.f32 %v3292_v12  ;;  %v4423_v39 = vpop.eup %4422 }
0x14c7   :  { %v3265_v42 = vmul.f32 %v4423_v39, %v3241_v38 }
0x14c8   :  { %v4425_v35 = vpop.eup %4424 }
0x14c9   :  { %v4427_v47 = vpop.eup %4426  ;;  %v3295_v49 = vadd.f32 1.0, %v4425_v35  ;;  %v3546_v61 = vmul.f32 -1.442695, %v3265_v42  ;;  %v3322_v35 = vmul.f32 %v5365_v1, %v5319_v27 }
0x14ca   :  { %v3294_v52 = vadd.f32 1.0, %v4427_v47  ;;  %v4429_v8 = vpop.eup %4428 }
0x14cb   :  { %4434 = vrcp.f32 %v3295_v49  ;;  %v3264_v20 = vmul.f32 %v4429_v8, %v3240_v54 }
0x14cc   :  { %4436 = vrcp.f32 %v3294_v52 }
0x14cd   :  { %4438 = vpow2.f32 %v3546_v61  ;;  %v3545_v41 = vmul.f32 -1.442695, %v3264_v20  ;;  %v3321_v61 = vmul.f32 %v5365_v1, %v5323_v31 }
0x14cf   :  { %v4431_v13 = vpop.eup %4430  ;;  %4440 = vpow2.f32 %v3545_v41 }
0x14d0   :  { %v4433_v9 = vpop.eup %4432  ;;  %v3326_v59 = vsub.f32 1.0, %v4431_v13  ;;  %v3342_v16 = vmul.f32 %v4431_v13, %v5280_v55 }
0x14d1   :  { %v3325_v29 = vsub.f32 1.0, %v4433_v9  ;;  %v3341_v7 = vmul.f32 %v4433_v9, %v5283_v3 }
0x14d2   :  { %v3334_v46 = vmul.f32 %v3326_v59, %v3318_v24 }
0x14d3   :  { %v3333_v17 = vmul.f32 %v3325_v29, %v3317_v63 }
0x14d4   :  { %v3350_v5 = vadd.f32 %v3342_v16, %v3334_v46 }
0x14d5   :  { %v3349_v37 = vadd.f32 %v3341_v7, %v3333_v17  ;;  %v4435_v43 = vpop.eup %4434 }
0x14d6   :  { %v3362_v19 = vmul.f32 %v5375_v15, %v3350_v5  ;;  %v4437_v21 = vpop.eup %4436  ;;  %v3328_v58 = vsub.f32 1.0, %v4435_v43  ;;  %v3344_v30 = vmul.f32 %v4435_v43, %v5294_v10 }
0x14d7   :  { %v4439_v14 = vpop.eup %4438  ;;  %v3361_v22 = vmul.f32 %v5375_v15, %v3349_v37  ;;  %v3327_v45 = vsub.f32 1.0, %v4437_v21  ;;  %v3343_v11 = vmul.f32 %v4437_v21, %v5297_v4 }
0x14d8   :  { %v3372_v55 = vsel %vm3067_vm12, %v3362_v19, 0.0  ;;  %v3297_v3 = vadd.f32 1.0, %v4439_v14  ;;  %v3336_v18 = vmul.f32 %v3328_v58, %v3320_v51 }
0x14d9   :  { %3373 = vadd.xlane.f32.xlu0 %v3372_v55  ;;  %v3335_v33 = vmul.f32 %v3327_v45, %v3319_v23  ;;  %v4441_v34 = vpop.eup %4440  ;;  %v3369_v48 = vsel %vm3067_vm12, %v3361_v22, 0.0 }
0x14da   :  { %4442 = vrcp.f32 %v3297_v3  ;;  %v3352_v50 = vadd.f32 %v3344_v30, %v3336_v18  ;;  %v3296_v53 = vadd.f32 1.0, %v4441_v34 }
0x14db   :  { %v3351_v28 = vadd.f32 %v3343_v11, %v3335_v33 }
0x14dc   :  { %v3364_v12 = vmul.f32 %v5375_v15, %v3352_v50  ;;  %4444 = vrcp.f32 %v3296_v53 }
0x14dd   :  { %3370 = vadd.xlane.f32.xlu0 %v3369_v48  ;;  %v3363_v38 = vmul.f32 %v5375_v15, %v3351_v28 }
0x14de   :  { %v3378_v10 = vsel %vm3067_vm12, %v3364_v12, 0.0 }
0x14df   :  { %v3375_v39 = vsel %vm3067_vm12, %v3363_v38, 0.0 }
0x14e0   :  { %3376 = vadd.xlane.f32.xlu1 %v3375_v39 }
0x14e1   :  { %3379 = vadd.xlane.f32.xlu0 %v3378_v10 }
0x14e4   :  { %v4443_v4 = vpop.eup %4442 }
0x14e5   :  { %v3330_v42 = vsub.f32 1.0, %v4443_v4  ;;  %v3346_v49 = vmul.f32 %v4443_v4, %v5319_v27 }
0x14e6   :  { %v4445_v52 = vpop.eup %4444 }
0x14e7   :  { %v3338_v47 = vmul.f32 %v3330_v42, %v3322_v35  ;;  %v3329_v54 = vsub.f32 1.0, %v4445_v52  ;;  %v3345_v13 = vmul.f32 %v4445_v52, %v5323_v31 }
0x14e9   :  { %v3354_v8 = vadd.f32 %v3346_v49, %v3338_v47  ;;  %v3337_v20 = vmul.f32 %v3329_v54, %v3321_v61 }
0x14eb   :  { %v3366_v9 = vmul.f32 %v5375_v15, %v3354_v8  ;;  %v3353_v41 = vadd.f32 %v3345_v13, %v3337_v20 }
0x14ed   :  { %v3384_v24 = vsel %vm3067_vm12, %v3366_v9, 0.0  ;;  %v3365_v59 = vmul.f32 %v5375_v15, %v3353_v41 }
0x14ee   :  { %3385 = vadd.xlane.f32.xlu0 %v3384_v24 }
0x14ef   :  { %v3381_v63 = vsel %vm3067_vm12, %v3365_v59, 0.0 }
0x14f0   :  { %3382 = vadd.xlane.f32.xlu1 %v3381_v63 }
0x14f5   :  { %v4057_v27 = vpop.f32.mrb[38].mxu0 }
0x14f6   :  { %v5403_v29 = vadd.f32 %v4057_v27, %v5277_v6  ;;  %v3038_v46 = vpop.f32.mrb[39].mxu0 }
0x14f7   :  { %v5406_v16 = vadd.f32 %v5277_v6, %v3038_v46 }
0x14f8   :  { %v3066_v31 = vmul.f32 %v5036_v56, %v5403_v29 }
0x14f9   :  { %v3065_v17 = vmul.f32 %v5036_v56, %v5406_v16 }
0x14fa   :  { %v3117_v7 = vsel %vm3067_vm12, %v3066_v31, 0.0  ;;  %v3131_v5 = vmul.f32 %v3066_v31, %v3066_v31 }
0x14fb   :  { %v3118_v37 = vrot.slane %v3117_v7, 4  ;;  %v3110_v43 = vsel %vm3067_vm12, %v3065_v17, 0.0  ;;  %v3130_v19 = vmul.f32 %v3065_v17, %v3065_v17 }
0x14fc   :  { %v3181_v21 = vsel %vm3067_vm12, %v3131_v5, 0.0  ;;  %v3111_v51 = vrot.slane %v3110_v43, 4 }
0x14fd   :  { %v3119_v58 = vadd.f32 %v3118_v37, %v3117_v7  ;;  %v3182_v14 = vrot.slane %v3181_v21, 4  ;;  %v3174_v6 = vsel %vm3067_vm12, %v3130_v19, 0.0 }
0x14fe   :  { %v3112_v55 = vadd.f32 %v3111_v51, %v3110_v43  ;;  %v3175_v22 = vrot.slane %v3174_v6, 4  ;;  %v3324_v51 = vmul.f32 %v5365_v1, %v5403_v29 }
0x14ff   :  { %v3120_v23 = vrot.slane %v3119_v58, 2  ;;  %v3183_v45 = vadd.f32 %v3182_v14, %v3181_v21  ;;  %v3323_v14 = vmul.f32 %v5365_v1, %v5406_v16 }
0x1500   :  { %v3113_v3 = vrot.slane %v3112_v55, 2  ;;  %v3176_v56 = vadd.f32 %v3175_v22, %v3174_v6 }
0x1501   :  { %v3121_v18 = vadd.f32 %v3120_v23, %v3119_v58  ;;  %v3184_v30 = vrot.slane %v3183_v45, 2 }
0x1502   :  { %v3114_v33 = vadd.f32 %v3113_v3, %v3112_v55  ;;  %v3177_v11 = vrot.slane %v3176_v56, 2 }
0x1503   :  { %v3122_v50 = vrot.slane %v3121_v18, 1  ;;  %v3185_v34 = vadd.f32 %v3184_v30, %v3183_v45 }
0x1504   :  { %v3115_v48 = vrot.slane %v3114_v33, 1  ;;  %v3178_v28 = vadd.f32 %v3177_v11, %v3176_v56 }
0x1505   :  { %v3123_v53 = vadd.f32 %v3122_v50, %v3121_v18  ;;  %v3186_v38 = vrot.slane %v3185_v34, 1 }
0x1506   :  { %v3116_v12 = vadd.f32 %v3115_v48, %v3114_v33  ;;  %v3179_v10 = vrot.slane %v3178_v28, 1 }
0x1507   :  { %v3195_v39 = vmul.f32 %v3123_v53, %v5153_v62  ;;  %v3187_v47 = vadd.f32 %v3186_v38, %v3185_v34  ;;  %v3393_v34 = vstv %s3455_s7 }
0x1508   :  { %v3194_v4 = vmul.f32 %v3116_v12, %v5153_v62  ;;  %v3180_v52 = vadd.f32 %v3179_v10, %v3178_v28 }
0x1509   :  { %v3203_v35 = vmul.f32 %v3195_v39, %v5156_v57  ;;  %v3243_v62 = vsub.f32 %v5403_v29, %v3195_v39 }
0x150a   :  { %v3202_v42 = vmul.f32 %v3194_v4, %v5156_v57  ;;  %v3242_v57 = vsub.f32 %v5406_v16, %v3194_v4 }
0x150b   :  { %v3211_v49 = vmul.f32 %v3203_v35, %v3195_v39 }
0x150c   :  { %v3210_v61 = vmul.f32 %v3202_v42, %v3194_v4 }
0x150d   :  { %v3219_v54 = vsub.f32 %v3187_v47, %v3211_v49 }
0x150e   :  { %v3218_v8 = vsub.f32 %v3180_v52, %v3210_v61 }
0x150f   :  { %v3227_v20 = vmul.f32 %v3219_v54, %v5164_v2 }
0x1510   :  { %v3226_v13 = vmul.f32 %v3218_v8, %v5164_v2 }
0x1511   :  { %v3235_v9 = vmax.f32 %v3227_v20, 0.0 }
0x1512   :  { %v3234_v41 = vmax.f32 %v3226_v13, 0.0 }
0x1513   :  { %v3251_v24 = vadd.f32 1e-09, %v3235_v9 }
0x1514   :  { %v3250_v59 = vadd.f32 1e-09, %v3234_v41 }
0x1515   :  { %4446 = vrsqrt.f32 %v3251_v24 }
0x1516   :  { %4448 = vrsqrt.f32 %v3250_v59 }
0x151f   :  { %v4447_v63 = vpop.eup %4446 }
0x1520   :  { %v4449_v27 = vpop.eup %4448  ;;  %v3267_v46 = vmul.f32 %v4447_v63, %v3243_v62 }
0x1521   :  { %v3266_v31 = vmul.f32 %v4449_v27, %v3242_v57 }
0x1522   :  { %v3548_v17 = vmul.f32 -1.442695, %v3267_v46 }
0x1523   :  { %v3547_v7 = vmul.f32 -1.442695, %v3266_v31 }
0x1524   :  { %4450 = vpow2.f32 %v3548_v17 }
0x1525   :  { %4452 = vpow2.f32 %v3547_v7 }
0x152e   :  { %v4451_v5 = vpop.eup %4450 }
0x152f   :  { %v4453_v2 = vpop.eup %4452  ;;  %v3299_v37 = vadd.f32 1.0, %v4451_v5 }
0x1530   :  { %v3298_v43 = vadd.f32 1.0, %v4453_v2 }
0x1531   :  { %4454 = vrcp.f32 %v3299_v37 }
0x1532   :  { %4456 = vrcp.f32 %v3298_v43 }
0x153b   :  { %v4455_v19 = vpop.eup %4454 }
0x153c   :  { %v4457_v21 = vpop.eup %4456  ;;  %v3332_v58 = vsub.f32 1.0, %v4455_v19  ;;  %v3348_v22 = vmul.f32 %v4455_v19, %v5403_v29 }
0x153d   :  { %v3331_v6 = vsub.f32 1.0, %v4457_v21  ;;  %v3347_v45 = vmul.f32 %v4457_v21, %v5406_v16 }
0x153e   :  { %v3340_v55 = vmul.f32 %v3332_v58, %v3324_v51 }
0x153f   :  { %v3339_v23 = vmul.f32 %v3331_v6, %v3323_v14 }
0x1540   :  { %v3356_v3 = vadd.f32 %v3348_v22, %v3340_v55 }
0x1541   :  { %v3355_v56 = vadd.f32 %v3347_v45, %v3339_v23 }
0x1542   :  { %v3368_v18 = vmul.f32 %v5375_v15, %v3356_v3 }
0x1543   :  { %v3367_v30 = vmul.f32 %v5375_v15, %v3355_v56 }
0x1544   :  { %v3390_v33 = vsel %vm3067_vm12, %v3368_v18, 0.0 }
0x1545   :  { %3391 = vadd.xlane.f32.xlu0 %v3390_v33  ;;  %v3387_v11 = vsel %vm3067_vm12, %v3367_v30, 0.0 }
0x1546   :  { %3388 = vadd.xlane.f32.xlu1 %v3387_v11 }
0x1566   :  { %v3374_v1 = vpop.xlane.xlu0 %3373 }
0x1567   :  { %v3395_v28 = vadd.f32 %v3393_v34, %v3374_v1 }
0x1569   :  { %v3403_v38 = vmul.f32 %v3395_v28, %v5039_v25 }
0x156a   :  { %v3371_v50 = vpop.xlane.xlu0 %3370 }
0x156b   :  { %v3394_v29 = vadd.f32 %v3393_v34, %v3371_v50  ;;  %v3412_v35 = vsel %vm3410_vm13, %v3403_v38, 0.0 }
0x156d   :  { %v3377_v48 = vpop.xlane.xlu1 %3376  ;;  %v3402_v16 = vmul.f32 %v3394_v29, %v5043_v36 }
0x156e   :  { %v3396_v53 = vadd.f32 %v3393_v34, %v3377_v48  ;;  %v3380_v12 = vpop.xlane.xlu0 %3379 }
0x156f   :  { %v3411_v15 = vsel %vm3410_vm13, %v3402_v16, 0.0  ;;  %v3397_v10 = vadd.f32 %v3393_v34, %v3380_v12 }
0x1570   :  { %v3404_v39 = vmul.f32 %v3396_v53, %v5053_v32  ;;  %v3413_v42 = vadd.f32 %v3412_v35, %v3411_v15 }
0x1571   :  { %v3405_v49 = vmul.f32 %v3397_v10, %v5050_v44 }
0x1572   :  { %v3414_v47 = vsel %vm3410_vm13, %v3404_v39, 0.0 }
0x1573   :  { %v3415_v61 = vadd.f32 %v3414_v47, %v3413_v42  ;;  %v3416_v54 = vsel %vm3410_vm13, %v3405_v49, 0.0 }
0x1575   :  { %v3417_v20 = vadd.f32 %v3416_v54, %v3415_v61 }
0x157b   :  { %v3386_v36 = vpop.xlane.xlu0 %3385 }
0x157c   :  { %v3399_v8 = vadd.f32 %v3393_v34, %v3386_v36 }
0x157d   :  { %v3383_v4 = vpop.xlane.xlu1 %3382 }
0x157e   :  { %v3398_v52 = vadd.f32 %v3393_v34, %v3383_v4  ;;  %v3407_v13 = vmul.f32 %v3399_v8, %v5060_v26 }
0x1580   :  { %v3406_v25 = vmul.f32 %v3398_v52, %v5063_v40  ;;  %v3420_v62 = vsel %vm3410_vm13, %v3407_v13, 0.0 }
0x1582   :  { %v3418_v32 = vsel %vm3410_vm13, %v3406_v25, 0.0 }
0x1583   :  { %v3419_v41 = vadd.f32 %v3418_v32, %v3417_v20 }
0x1585   :  { %v3421_v27 = vadd.f32 %v3420_v62, %v3419_v41 }
0x15d2   :  { %v3392_v9 = vpop.xlane.xlu0 %3391 }
0x15d3   :  { %v3401_v24 = vadd.f32 %v3393_v34, %v3392_v9  ;;  %v3389_v59 = vpop.xlane.xlu1 %3388 }
0x15d4   :  { %v3400_v44 = vadd.f32 %v3393_v34, %v3389_v59 }
0x15d5   :  { %v3409_v63 = vmul.f32 %v3401_v24, %v5076_v0 }
0x15d6   :  { %v3408_v57 = vmul.f32 %v3400_v44, %v5070_v60 }
0x15d7   :  { %v3424_v31 = vsel %vm3410_vm13, %v3409_v63, 0.0 }
0x15d8   :  { %v3422_v40 = vsel %vm3410_vm13, %v3408_v57, 0.0 }
0x15d9   :  { %v3423_v46 = vadd.f32 %v3422_v40, %v3421_v27 }
0x15db   :  { %v3425_v17 = vadd.f32 %v3424_v31, %v3423_v46 }
0x15dd   :  { %3427 = vrot.lane.b32.xlu1 %v3425_v17, %s4502_s23 }
0x164f   :  { %v3428_v26 = vpop.permute.xlu1 %3427 }
0x1650   :  { %3430 = vst.msk [vmem:[#allocation5] sm:$0xff] %vm94_vm0, %v3428_v26 }
0x1651   :  { %4481 = shalt.err (!%p4478_p9)
}
0x1652   :  { %s4482_s5 = scalar_lea.hbm %s5473_s9, 128 }
0x1653   :  { %p4483_p10 = scmp.ne.s32.totalorder %s5473_s9, %s4482_s5  ;;  %p4486_p11 = scmp.lt.u32.totalorder %s4482_s5, %s5473_s9 }
0x1655   :  { %p4488_p12 = pnand %p4486_p11, %p4483_p10 }
0x1657   :  { %4491 = shalt.err (!%p4488_p12)
}
0x1658   :  { %3440 = dma.vmem_to_hbm [thread:$0]  %s3438_s21, 128, %s5473_s9, [#allocation3]  }
0x1659   :  { %4494 = dma.done.wait [#allocation3], 128  }
0x165a   :  { %4495 = vsyncadd [#allocation3], 4294967168 }
0x165b   :  { %3444 = vsyncpa [#allocation3], 1 }
0x165c   :  { %3445 = vsyncpa [#allocation4], 1 }

</bundles_post_ra>
